<compile_context>
chip_gen: v5e
topology: v5e:2x2
jax: 0.10.0
libtpu: 0.0.40
codegen_flags: <defaults>
</compile_context>

<pallas_src>
import math
from functools import partial

import jax
import jax.numpy as jnp
from jax import lax
from jax.experimental import pallas as pl
from jax.experimental.pallas import tpu as pltpu

GN_EPS = 1e-5


def _attention_block_kernel(x_ref, gamma_ref, beta_ref, m_ref, mt_ref,
                            wq_ref, bq_ref, wkv_ref, bkv_ref, wp_ref, bp_ref,
                            o_ref,
                            scale_sc, shift_sc, k_sc, v_sc,
                            *, n_elems, cp, ones_col, tq, kv_chunk, exp_dtype):
    """Grid = (B, HW // TQ); qt axis is 'arbitrary' (K/V scratch carries across it).

    x_ref:      (1, HW, Cp)   f32   one batch element (residual + GN + Q/K/V source)
    gamma/beta: (1, Cp)       f32   GroupNorm affine (zero on pad channels)
    m_ref:      (Cp, G)       f32   one-hot channel->group membership
    mt_ref:     (G, Cp)       f32   its transpose (precomputed in wrapper)
    wq_ref:     (Cp, Cp)      bf16  Q weight with 1/sqrt(C) folded in
    bq_ref:     (1, Cp)       f32   Q bias with 1/sqrt(C) folded in
    wkv_ref:    (Cp, Cp+Cpv)  bf16  fused K|V weight (V has an extra "ones" column)
    bkv_ref:    (1, Cp+Cpv)   f32
    wp_ref:     (Cpv, Cp)     bf16  output projection (zero rows for pad/ones cols)
    bp_ref:     (1, Cp)       f32
    o_ref:      (1, TQ, Cp)   f32
    scratch: scale_sc/shift_sc (1, Cp) f32      folded GroupNorm scale/shift
             k_sc (HW, Cp) / v_sc (HW, Cpv) bf16  per-batch K / V (reused over qt)
    """
    qt = pl.program_id(1)

    # ---------------- per-batch work (first query tile only) ----------------
    @pl.when(qt == 0)
    def _():
        x_full = x_ref[0]                                            # (HW, Cp)
        ch_sum = jnp.sum(x_full, axis=0, keepdims=True)              # (1, Cp)
        ch_sq = jnp.sum(x_full * x_full, axis=0, keepdims=True)      # (1, Cp)
        # one fused (2, Cp) @ (Cp, G) matmul gives group sums of x and x^2
        stats = jnp.dot(jnp.concatenate([ch_sum, ch_sq], axis=0), m_ref[...],
                        preferred_element_type=jnp.float32)          # (2, G)
        mean = stats[0:1] * (1.0 / n_elems)                          # (1, G)
        var = jnp.maximum(stats[1:2] * (1.0 / n_elems) - mean * mean, 0.0)
        # broadcast group stats back to channels with one (2, G) @ (G, Cp)
        mv_c = jnp.dot(jnp.concatenate([mean, var], axis=0), mt_ref[...],
                       preferred_element_type=jnp.float32)           # (2, Cp)
        inv_c = lax.rsqrt(mv_c[1:2] + GN_EPS)
        scale_c = inv_c * gamma_ref[...]                             # (1, Cp)
        shift_c = beta_ref[...] - mv_c[0:1] * scale_c                # (1, Cp)
        scale_sc[...] = scale_c
        shift_sc[...] = shift_c

        # fused K|V projection, chunked over HW: writes bf16 straight into the
        # K/V scratch (no fp32 (HW, 2*Cp) temporary).
        def kv_body(r, carry):
            rs = pl.multiple_of(r * kv_chunk, kv_chunk)
            xn = (x_ref[0, pl.ds(rs, kv_chunk), :] * scale_c
                  + shift_c).astype(jnp.bfloat16)
            kv = jnp.dot(xn, wkv_ref[...],
                         preferred_element_type=jnp.float32) + bkv_ref[...]
            k_sc[pl.ds(rs, kv_chunk), :] = kv[:, :cp].astype(jnp.bfloat16)
            v_sc[pl.ds(rs, kv_chunk), :] = kv[:, cp:].astype(jnp.bfloat16)
            return carry

        n_chunks = k_sc.shape[0] // kv_chunk
        lax.fori_loop(0, n_chunks, kv_body, 0, unroll=n_chunks <= 2)

    # ---------------- per-query-tile work ------------------------------------
    q0 = pl.multiple_of(qt * tq, tq)
    x_q = x_ref[0, pl.ds(q0, tq), :]                                 # (TQ, Cp) f32
    xn_q = (x_q * scale_sc[...] + shift_sc[...]).astype(jnp.bfloat16)
    q = jnp.dot(xn_q, wq_ref[...],
                preferred_element_type=jnp.float32) + bq_ref[...]    # scale folded
    q = q.astype(jnp.bfloat16)

    # scores: contract channel dims directly (no in-kernel transpose of K)
    s = lax.dot_general(q, k_sc[...],
                        dimension_numbers=(((1,), (1,)), ((), ())),
                        preferred_element_type=jnp.float32)          # (TQ, HW)
    s = s - jnp.max(s, axis=-1, keepdims=True)
    p = jnp.exp(s.astype(exp_dtype))                                 # bf16 on v6e/v7x

    # p @ V also produces the softmax denominator in the "ones" column of V
    pv = jnp.dot(p.astype(jnp.bfloat16), v_sc[...],
                 preferred_element_type=jnp.float32)                 # (TQ, Cpv)
    inv_l = pl.reciprocal(pv[:, ones_col:ones_col + 1], approx=True) # (TQ, 1)

    # output projection; per-row softmax normalization applied after (wp rows
    # for the pad / ones columns are zero so they contribute nothing)
    out = jnp.dot(pv.astype(jnp.bfloat16), wp_ref[...],
                  preferred_element_type=jnp.float32) * inv_l + bp_ref[...]
    o_ref[0] = x_q + out
    # TODO(synk): for very large HW (>~4k at Cp>=512; earlier on v7x's 64 MiB
    # VMEM) add a KV-tile grid axis with online softmax instead of keeping the
    # full K/V resident in scratch.


def _round_up(x, m):
    return (x + m - 1) // m * m


def _pick_tq(hw):
    """Largest divisor-of-HW tile keeping the (TQ, HW) fp32 score/prob transients
    (~3 copies) under ~6 MiB, so the kernel also fits v7x's 64 MiB VMEM."""
    cap = max(64, (6 * 1024 * 1024) // (12 * hw))
    for t in (512, 256, 128, 64, 32, 16, 8):
        if t <= cap and hw % t == 0:
            return t
    for t in (512, 256, 128, 64, 32, 16, 8):
        if hw % t == 0:
            return t
    return hw   # odd HW: legal (equals the full dim) but wastes sublanes


def _pick_kv_chunk(hw):
    for t in (256, 128, 64, 32, 16, 8):
        if hw % t == 0:
            return t
    return hw


def _softmax_exp_dtype():
    """bf16 exp/probabilities on v6e/v7x (bf16 VPU+EUP); fp32 on <= v5."""
    try:
        kind = jax.devices()[0].device_kind.lower()
    except Exception:
        return jnp.float32
    if any(g in kind for g in ("v2", "v3", "v4", "v5")):
        return jnp.float32
    return jnp.bfloat16


def attention_block(x_nchw, params):
    """x_nchw: (B, C, H, W) float32. params: dict of weights (see init_params)."""
    B, C, H, W = x_nchw.shape
    HW = H * W
    G = params["num_groups"]
    cs = C // G
    scale = 1.0 / math.sqrt(C)

    # pad channels to a lane multiple so every load/store is lane dense
    Cp = _round_up(C, 128)
    pad_c = Cp - C
    # V gets a "ones" value column so p @ V also yields the softmax row sums:
    # reuse a zero pad channel when available, else append one more lane block.
    if pad_c > 0:
        Cpv, ones_col = Cp, C
    else:
        Cpv, ones_col = Cp + 128, Cp

    TQ = _pick_tq(HW)
    NQ = HW // TQ
    KVC = _pick_kv_chunk(HW)
    exp_dtype = _softmax_exp_dtype()

    # TODO(synk): keep activations channels-last across the surrounding model (or
    # fuse this transpose/pad into the producer) to avoid two extra HBM passes.
    x_tok = jnp.transpose(x_nchw, (0, 2, 3, 1)).reshape(B, HW, C)
    x_tok = jnp.pad(x_tok, ((0, 0), (0, 0), (0, pad_c)))              # (B, HW, Cp)

    # group membership (padded channels belong to no group -> zero rows)
    ch = jnp.arange(Cp)
    M = (((ch[:, None] // cs) == jnp.arange(G)[None, :]) & (ch[:, None] < C))
    M = M.astype(jnp.float32)                                         # (Cp, G)
    MT = M.T                                                          # (G, Cp)

    def conv_to_mat(w):   # Conv2d 1x1 weight (Cout, Cin, 1, 1) -> (Cin, Cout)
        return w.reshape(C, C).T

    def pad_mat(w):
        return jnp.pad(w, ((0, pad_c), (0, pad_c)))

    def pad_vec(v):
        return jnp.pad(v, (0, pad_c)).reshape(1, Cp)

    # fold the 1/sqrt(C) attention scale into wq / bq
    wq = pad_mat(conv_to_mat(params["wq"]) * scale).astype(jnp.bfloat16)
    bq = pad_vec(params["bq"] * scale)

    wv_m = pad_mat(conv_to_mat(params["wv"]))
    bv_v = pad_vec(params["bv"])
    if Cpv > Cp:
        wv_m = jnp.pad(wv_m, ((0, 0), (0, Cpv - Cp)))
        bv_v = jnp.pad(bv_v, ((0, 0), (0, Cpv - Cp)))
    bv_v = bv_v.at[0, ones_col].set(1.0)          # the "ones" value column
    wkv = jnp.concatenate([pad_mat(conv_to_mat(params["wk"])), wv_m],
                          axis=1).astype(jnp.bfloat16)                # (Cp, Cp+Cpv)
    bkv = jnp.concatenate([pad_vec(params["bk"]), bv_v], axis=1)      # (1, Cp+Cpv)

    wp_m = pad_mat(conv_to_mat(params["wp"]))                         # (Cp, Cp)
    if Cpv > Cp:
        wp_m = jnp.pad(wp_m, ((0, Cpv - Cp), (0, 0)))                 # zero rows
    wp = wp_m.astype(jnp.bfloat16)                                    # (Cpv, Cp)
    bp = pad_vec(params["bp"])
    gamma = pad_vec(params["gn_gamma"])
    beta = pad_vec(params["gn_beta"])

    # explicit VMEM budget (default scoped limit is only 16/32 MiB)
    est = (2 * HW * Cp * 4                           # x double buffer
           + 2 * TQ * Cp * 4                         # output double buffer
           + 2 * (2 * Cp * 4 + Cp * G * 4 + G * Cp * 4
                  + Cp * Cp * 2 + Cp * 4
                  + Cp * (Cp + Cpv) * 2 + (Cp + Cpv) * 4
                  + Cpv * Cp * 2 + Cp * 4)           # invariant weights (x2 buffers)
           + 2 * Cp * 4 + HW * Cp * 2 + HW * Cpv * 2  # scratch
           + 4 * TQ * HW * 4                         # score / prob transients
           + HW * Cp * 4                             # GN stats temporaries
           + KVC * (Cp + Cpv) * 4)                   # chunked K|V temporary
    vmem_limit = int(min(max(2 * est, 32 << 20), 100 << 20))

    const2 = lambda shape: pl.BlockSpec(shape, lambda b, qt: (0, 0))

    kernel = partial(_attention_block_kernel,
                     n_elems=float(HW * cs), cp=Cp, ones_col=ones_col,
                     tq=TQ, kv_chunk=KVC, exp_dtype=exp_dtype)

    out_tok = pl.pallas_call(
        kernel,
        out_shape=jax.ShapeDtypeStruct((B, HW, Cp), jnp.float32),
        grid_spec=pltpu.PrefetchScalarGridSpec(
            num_scalar_prefetch=0,
            grid=(B, NQ),
            in_specs=[
                pl.BlockSpec((1, HW, Cp), lambda b, qt: (b, 0, 0)),   # x (per batch)
                const2((1, Cp)), const2((1, Cp)),                     # gamma, beta
                const2((Cp, G)), const2((G, Cp)),                     # M, M^T
                const2((Cp, Cp)), const2((1, Cp)),                    # wq, bq
                const2((Cp, Cp + Cpv)), const2((1, Cp + Cpv)),        # wkv, bkv
                const2((Cpv, Cp)), const2((1, Cp)),                   # wp, bp
            ],
            out_specs=pl.BlockSpec((1, TQ, Cp), lambda b, qt: (b, qt, 0)),
            scratch_shapes=[
                pltpu.VMEM((1, Cp), jnp.float32),      # GroupNorm scale
                pltpu.VMEM((1, Cp), jnp.float32),      # GroupNorm shift
                pltpu.VMEM((HW, Cp), jnp.bfloat16),    # K (per batch element)
                pltpu.VMEM((HW, Cpv), jnp.bfloat16),   # V (+ ones column)
            ]),
        compiler_params=pltpu.CompilerParams(
            dimension_semantics=("parallel", "arbitrary"),
            vmem_limit_bytes=vmem_limit),
    )(x_tok, gamma, beta, M, MT, wq, bq, wkv, bkv, wp, bp)
    # TODO(synk): for B < 2 on v7x (2 TensorCores) split the qt range across cores
    # (or hoist GN+KV into a separate pallas_call) so both grid axes are 'parallel'.

    out_tok = out_tok[:, :, :C]
    return out_tok.reshape(B, H, W, C).transpose(0, 3, 1, 2)


def init_params(key, in_ch, num_groups=32):
    ks = jax.random.split(key, 8)
    bound = 1.0 / math.sqrt(in_ch)   # matches Conv2d default fan-in bound
    def conv_w(k):
        return jax.random.uniform(k, (in_ch, in_ch, 1, 1), jnp.float32, -bound, bound)
    def conv_b(k):
        return jax.random.uniform(k, (in_ch,), jnp.float32, -bound, bound)
    return {
        "num_groups": num_groups,
        "gn_gamma": jnp.ones((in_ch,), jnp.float32),
        "gn_beta": jnp.zeros((in_ch,), jnp.float32),
        "wq": conv_w(ks[0]), "bq": conv_b(ks[1]),
        "wk": conv_w(ks[2]), "bk": conv_b(ks[3]),
        "wv": conv_w(ks[4]), "bv": conv_b(ks[5]),
        "wp": conv_w(ks[6]), "bp": conv_b(ks[7]),
    }


def attention_block_reference(x, params):
    """Pure-JAX fp32 reference mirroring the PyTorch forward (for verification)."""
    B, C, H, W = x.shape
    G = params["num_groups"]
    cs = C // G
    xg = x.reshape(B, G, cs, H, W)
    mean = xg.mean(axis=(2, 3, 4), keepdims=True)
    var = ((xg - mean) ** 2).mean(axis=(2, 3, 4), keepdims=True)
    xn = ((xg - mean) / jnp.sqrt(var + GN_EPS)).reshape(B, C, H, W)
    xn = xn * params["gn_gamma"][None, :, None, None] + params["gn_beta"][None, :, None, None]

    def conv1x1(t, w, b):
        return jnp.einsum("bchw,oc->bohw", t, w.reshape(C, C)) + b[None, :, None, None]

    q = conv1x1(xn, params["wq"], params["bq"])
    k = conv1x1(xn, params["wk"], params["bk"])
    v = conv1x1(xn, params["wv"], params["bv"])
    q = q.transpose(0, 2, 3, 1).reshape(B, H * W, C)
    k = k.reshape(B, C, H * W)
    w = jnp.einsum("bqc,bck->bqk", q, k) / math.sqrt(C)
    w = jax.nn.softmax(w, axis=-1)
    v = v.transpose(0, 2, 3, 1).reshape(B, H * W, C)
    o = jnp.einsum("bqk,bkc->bqc", w, v)
    o = o.reshape(B, H, W, C).transpose(0, 3, 1, 2)
    o = conv1x1(o, params["wp"], params["bp"])
    return x + o


if __name__ == "__main__":
    key = jax.random.PRNGKey(0)
    k_x, k_p = jax.random.split(key)

    B, C, H, W = 2, 64, 8, 8   # GroupNorm(32, C) requires C % 32 == 0
    x = jax.random.normal(k_x, (B, C, H, W), jnp.float32)
    params = init_params(k_p, C, num_groups=32)

    out = jax.block_until_ready(attention_block(x, params))

    ref = attention_block_reference(x, params)
    assert out.shape == ref.shape == (B, C, H, W)
    max_diff = float(jnp.max(jnp.abs(out - ref)))
    # bf16 MXU operands / bf16 softmax probs + approx reciprocal -> loose tolerance
    assert max_diff < 2e-2, f"max abs diff {max_diff}"

    print("KERNEL_OK")
</pallas_src>

<mosaic_0001>
module attributes {stable_mosaic.version = 11 : i64} {
  func.func @_attention_block_kernel(%arg0: i32, %arg1: i32, %arg2: memref<1x64x128xf32, #tpu.memory_space<vmem>>, %arg3: memref<1x128xf32, #tpu.memory_space<vmem>>, %arg4: memref<1x128xf32, #tpu.memory_space<vmem>>, %arg5: memref<128x32xf32, #tpu.memory_space<vmem>>, %arg6: memref<32x128xf32, #tpu.memory_space<vmem>>, %arg7: memref<128x128xbf16, #tpu.memory_space<vmem>>, %arg8: memref<1x128xf32, #tpu.memory_space<vmem>>, %arg9: memref<128x256xbf16, #tpu.memory_space<vmem>>, %arg10: memref<1x256xf32, #tpu.memory_space<vmem>>, %arg11: memref<128x128xbf16, #tpu.memory_space<vmem>>, %arg12: memref<1x128xf32, #tpu.memory_space<vmem>>, %arg13: memref<1x64x128xf32, #tpu.memory_space<vmem>>, %arg14: memref<1x128xf32, #tpu.memory_space<vmem>>, %arg15: memref<1x128xf32, #tpu.memory_space<vmem>>, %arg16: memref<64x128xbf16, #tpu.memory_space<vmem>>, %arg17: memref<64x128xbf16, #tpu.memory_space<vmem>>) attributes {dimension_semantics = [#tpu.dimension_semantics<parallel>, #tpu.dimension_semantics<arbitrary>], iteration_bounds = array<i64: 2, 1>, scalar_prefetch = 0 : i64, scratch_operands = 4 : i64, tpu.core_type = #tpu.core_type<tc>, window_params = [{transform_indices = @transform_0, window_bounds = array<i64: 1, 64, 128>}, {pipeline_mode = #tpu.pipeline_mode<synchronous>, transform_indices = @transform_1, window_bounds = array<i64: 1, 128>}, {pipeline_mode = #tpu.pipeline_mode<synchronous>, transform_indices = @transform_2, window_bounds = array<i64: 1, 128>}, {pipeline_mode = #tpu.pipeline_mode<synchronous>, transform_indices = @transform_3, window_bounds = array<i64: 128, 32>}, {pipeline_mode = #tpu.pipeline_mode<synchronous>, transform_indices = @transform_4, window_bounds = array<i64: 32, 128>}, {pipeline_mode = #tpu.pipeline_mode<synchronous>, transform_indices = @transform_5, window_bounds = array<i64: 128, 128>}, {pipeline_mode = #tpu.pipeline_mode<synchronous>, transform_indices = @transform_6, window_bounds = array<i64: 1, 128>}, {pipeline_mode = #tpu.pipeline_mode<synchronous>, transform_indices = @transform_7, window_bounds = array<i64: 128, 256>}, {pipeline_mode = #tpu.pipeline_mode<synchronous>, transform_indices = @transform_8, window_bounds = array<i64: 1, 256>}, {pipeline_mode = #tpu.pipeline_mode<synchronous>, transform_indices = @transform_9, window_bounds = array<i64: 128, 128>}, {pipeline_mode = #tpu.pipeline_mode<synchronous>, transform_indices = @transform_10, window_bounds = array<i64: 1, 128>}, {transform_indices = @transform_11, window_bounds = array<i64: 1, 64, 128>}]} {
    %c0_i32 = arith.constant 0 : i32
    %0 = arith.cmpi eq, %arg1, %c0_i32 : i32
    %1 = arith.extui %0 : i1 to i32
    %c0_i32_0 = arith.constant 0 : i32
    %2 = arith.cmpi ne, %1, %c0_i32_0 : i32
    scf.if %2 {
      %c0_25 = arith.constant 0 : index
      %c0_26 = arith.constant 0 : index
      %c0_27 = arith.constant 0 : index
      %45 = vector.load %arg2[%c0_25, %c0_26, %c0_27] : memref<1x64x128xf32, #tpu.memory_space<vmem>>, vector<1x64x128xf32>
      %46 = vector.shape_cast %45 : vector<1x64x128xf32> to vector<64x128xf32>
      %cst_28 = arith.constant dense<0.000000e+00> : vector<128xf32>
      %47 = vector.multi_reduction <add>, %46, %cst_28 [0] : vector<64x128xf32> to vector<128xf32>
      %48 = vector.shape_cast %47 : vector<128xf32> to vector<1x128xf32>
      %49 = arith.mulf %46, %46 : vector<64x128xf32>
      %cst_29 = arith.constant dense<0.000000e+00> : vector<128xf32>
      %50 = vector.multi_reduction <add>, %49, %cst_29 [0] : vector<64x128xf32> to vector<128xf32>
      %51 = vector.shape_cast %50 : vector<128xf32> to vector<1x128xf32>
      %52 = tpu.concatenate %48, %51 in 0 : vector<1x128xf32>, vector<1x128xf32> -> vector<2x128xf32>
      %c0_30 = arith.constant 0 : index
      %c0_31 = arith.constant 0 : index
      %53 = vector.load %arg5[%c0_30, %c0_31] : memref<128x32xf32, #tpu.memory_space<vmem>>, vector<128x32xf32>
      %cst_32 = arith.constant dense<0.000000e+00> : vector<2x32xf32>
      %54 = tpu.matmul %52, %53, %cst_32 {dimension_numbers = #tpu.dot_dimension_numbers<[1], [0], [0], [1], [0, 0, 1, 1], [], []>} : vector<2x128xf32>, vector<128x32xf32>, vector<2x32xf32> -> vector<2x32xf32>
      %55 = vector.extract_strided_slice %54 {offsets = [0, 0], sizes = [1, 32], strides = [1, 1]} : vector<2x32xf32> to vector<1x32xf32>
      %cst_33 = arith.constant 7.812500e-03 : f32
      %56 = vector.broadcast %cst_33 : f32 to vector<1x32xf32>
      %57 = arith.mulf %55, %56 : vector<1x32xf32>
      %58 = vector.extract_strided_slice %54 {offsets = [1, 0], sizes = [1, 32], strides = [1, 1]} : vector<2x32xf32> to vector<1x32xf32>
      %cst_34 = arith.constant 7.812500e-03 : f32
      %59 = vector.broadcast %cst_34 : f32 to vector<1x32xf32>
      %60 = arith.mulf %58, %59 : vector<1x32xf32>
      %61 = arith.mulf %57, %57 : vector<1x32xf32>
      %62 = arith.subf %60, %61 : vector<1x32xf32>
      %cst_35 = arith.constant 0.000000e+00 : f32
      %63 = vector.broadcast %cst_35 : f32 to vector<1x32xf32>
      %64 = arith.maximumf %62, %63 : vector<1x32xf32>
      %65 = tpu.concatenate %57, %64 in 0 : vector<1x32xf32>, vector<1x32xf32> -> vector<2x32xf32>
      %c0_36 = arith.constant 0 : index
      %c0_37 = arith.constant 0 : index
      %66 = vector.load %arg6[%c0_36, %c0_37] : memref<32x128xf32, #tpu.memory_space<vmem>>, vector<32x128xf32>
      %cst_38 = arith.constant dense<0.000000e+00> : vector<2x128xf32>
      %67 = tpu.matmul %65, %66, %cst_38 {dimension_numbers = #tpu.dot_dimension_numbers<[1], [0], [0], [1], [0, 0, 1, 1], [], []>} : vector<2x32xf32>, vector<32x128xf32>, vector<2x128xf32> -> vector<2x128xf32>
      %68 = vector.extract_strided_slice %67 {offsets = [1, 0], sizes = [1, 128], strides = [1, 1]} : vector<2x128xf32> to vector<1x128xf32>
      %cst_39 = arith.constant 9.99999974E-6 : f32
      %69 = vector.broadcast %cst_39 : f32 to vector<1x128xf32>
      %70 = arith.addf %68, %69 : vector<1x128xf32>
      %71 = math.rsqrt %70 : vector<1x128xf32>
      %c0_40 = arith.constant 0 : index
      %c0_41 = arith.constant 0 : index
      %72 = vector.load %arg3[%c0_40, %c0_41] : memref<1x128xf32, #tpu.memory_space<vmem>>, vector<1x128xf32>
      %73 = arith.mulf %71, %72 : vector<1x128xf32>
      %c0_42 = arith.constant 0 : index
      %c0_43 = arith.constant 0 : index
      %74 = vector.load %arg4[%c0_42, %c0_43] : memref<1x128xf32, #tpu.memory_space<vmem>>, vector<1x128xf32>
      %75 = vector.extract_strided_slice %67 {offsets = [0, 0], sizes = [1, 128], strides = [1, 1]} : vector<2x128xf32> to vector<1x128xf32>
      %76 = arith.mulf %75, %73 : vector<1x128xf32>
      %77 = arith.subf %74, %76 : vector<1x128xf32>
      %c0_44 = arith.constant 0 : index
      %c0_45 = arith.constant 0 : index
      %78 = vector.load %arg14[%c0_44, %c0_45] : memref<1x128xf32, #tpu.memory_space<vmem>>, vector<1x128xf32>
      tpu.vector_store %arg14[%c0_44, %c0_45], %73 {strides = array<i32>} : memref<1x128xf32, #tpu.memory_space<vmem>>, vector<1x128xf32>,
      %c0_46 = arith.constant 0 : index
      %c0_47 = arith.constant 0 : index
      %79 = vector.load %arg15[%c0_46, %c0_47] : memref<1x128xf32, #tpu.memory_space<vmem>>, vector<1x128xf32>
      tpu.vector_store %arg15[%c0_46, %c0_47], %77 {strides = array<i32>} : memref<1x128xf32, #tpu.memory_space<vmem>>, vector<1x128xf32>,
      %c0_i32_48 = arith.constant 0 : i32
      %c64_i32_49 = arith.constant 64 : i32
      %80 = arith.muli %c0_i32_48, %c64_i32_49 : i32
      %81 = tpu.assume_multiple %80, 64 : i32
      %c0_50 = arith.constant 0 : index
      %82 = arith.index_cast %81 : i32 to index
      %c0_51 = arith.constant 0 : index
      %83 = vector.load %arg2[%c0_50, %82, %c0_51] : memref<1x64x128xf32, #tpu.memory_space<vmem>>, vector<1x64x128xf32>
      %84 = vector.shape_cast %83 : vector<1x64x128xf32> to vector<64x128xf32>
      %85 = vector.broadcast %73 : vector<1x128xf32> to vector<64x128xf32>
      %86 = arith.mulf %84, %85 : vector<64x128xf32>
      %87 = vector.broadcast %77 : vector<1x128xf32> to vector<64x128xf32>
      %88 = arith.addf %86, %87 : vector<64x128xf32>
      %89 = arith.truncf %88 : vector<64x128xf32> to vector<64x128xbf16>
      %c0_52 = arith.constant 0 : index
      %c0_53 = arith.constant 0 : index
      %90 = vector.load %arg9[%c0_52, %c0_53] : memref<128x256xbf16, #tpu.memory_space<vmem>>, vector<128x256xbf16>
      %cst_54 = arith.constant dense<0.000000e+00> : vector<64x256xf32>
      %91 = tpu.matmul %89, %90, %cst_54 {dimension_numbers = #tpu.dot_dimension_numbers<[1], [0], [0], [1], [0, 0, 1, 1], [], []>} : vector<64x128xbf16>, vector<128x256xbf16>, vector<64x256xf32> -> vector<64x256xf32>
      %c0_55 = arith.constant 0 : index
      %c0_56 = arith.constant 0 : index
      %92 = vector.load %arg10[%c0_55, %c0_56] : memref<1x256xf32, #tpu.memory_space<vmem>>, vector<1x256xf32>
      %93 = vector.broadcast %92 : vector<1x256xf32> to vector<64x256xf32>
      %94 = arith.addf %91, %93 : vector<64x256xf32>
      %95 = vector.extract_strided_slice %94 {offsets = [0, 0], sizes = [64, 128], strides = [1, 1]} : vector<64x256xf32> to vector<64x128xf32>
      %96 = arith.truncf %95 : vector<64x128xf32> to vector<64x128xbf16>
      %97 = arith.index_cast %81 : i32 to index
      %c0_57 = arith.constant 0 : index
      %98 = vector.load %arg16[%97, %c0_57] : memref<64x128xbf16, #tpu.memory_space<vmem>>, vector<64x128xbf16>
      tpu.vector_store %arg16[%97, %c0_57], %96 {strides = array<i32>} : memref<64x128xbf16, #tpu.memory_space<vmem>>, vector<64x128xbf16>,
      %99 = vector.extract_strided_slice %94 {offsets = [0, 128], sizes = [64, 128], strides = [1, 1]} : vector<64x256xf32> to vector<64x128xf32>
      %100 = arith.truncf %99 : vector<64x128xf32> to vector<64x128xbf16>
      %101 = arith.index_cast %81 : i32 to index
      %c0_58 = arith.constant 0 : index
      %102 = vector.load %arg17[%101, %c0_58] : memref<64x128xbf16, #tpu.memory_space<vmem>>, vector<64x128xbf16>
      tpu.vector_store %arg17[%101, %c0_58], %100 {strides = array<i32>} : memref<64x128xbf16, #tpu.memory_space<vmem>>, vector<64x128xbf16>,
      %c1_i32 = arith.constant 1 : i32
    } else {
    }
    %c64_i32 = arith.constant 64 : i32
    %3 = arith.muli %arg1, %c64_i32 : i32
    %4 = tpu.assume_multiple %3, 64 : i32
    %c0 = arith.constant 0 : index
    %5 = arith.index_cast %4 : i32 to index
    %c0_1 = arith.constant 0 : index
    %6 = vector.load %arg2[%c0, %5, %c0_1] : memref<1x64x128xf32, #tpu.memory_space<vmem>>, vector<1x64x128xf32>
    %7 = vector.shape_cast %6 : vector<1x64x128xf32> to vector<64x128xf32>
    %c0_2 = arith.constant 0 : index
    %c0_3 = arith.constant 0 : index
    %8 = vector.load %arg14[%c0_2, %c0_3] : memref<1x128xf32, #tpu.memory_space<vmem>>, vector<1x128xf32>
    %9 = vector.broadcast %8 : vector<1x128xf32> to vector<64x128xf32>
    %10 = arith.mulf %7, %9 : vector<64x128xf32>
    %c0_4 = arith.constant 0 : index
    %c0_5 = arith.constant 0 : index
    %11 = vector.load %arg15[%c0_4, %c0_5] : memref<1x128xf32, #tpu.memory_space<vmem>>, vector<1x128xf32>
    %12 = vector.broadcast %11 : vector<1x128xf32> to vector<64x128xf32>
    %13 = arith.addf %10, %12 : vector<64x128xf32>
    %14 = arith.truncf %13 : vector<64x128xf32> to vector<64x128xbf16>
    %c0_6 = arith.constant 0 : index
    %c0_7 = arith.constant 0 : index
    %15 = vector.load %arg7[%c0_6, %c0_7] : memref<128x128xbf16, #tpu.memory_space<vmem>>, vector<128x128xbf16>
    %cst = arith.constant dense<0.000000e+00> : vector<64x128xf32>
    %16 = tpu.matmul %14, %15, %cst {dimension_numbers = #tpu.dot_dimension_numbers<[1], [0], [0], [1], [0, 0, 1, 1], [], []>} : vector<64x128xbf16>, vector<128x128xbf16>, vector<64x128xf32> -> vector<64x128xf32>
    %c0_8 = arith.constant 0 : index
    %c0_9 = arith.constant 0 : index
    %17 = vector.load %arg8[%c0_8, %c0_9] : memref<1x128xf32, #tpu.memory_space<vmem>>, vector<1x128xf32>
    %18 = vector.broadcast %17 : vector<1x128xf32> to vector<64x128xf32>
    %19 = arith.addf %16, %18 : vector<64x128xf32>
    %20 = arith.truncf %19 : vector<64x128xf32> to vector<64x128xbf16>
    %c0_10 = arith.constant 0 : index
    %c0_11 = arith.constant 0 : index
    %21 = vector.load %arg16[%c0_10, %c0_11] : memref<64x128xbf16, #tpu.memory_space<vmem>>, vector<64x128xbf16>
    %cst_12 = arith.constant dense<0.000000e+00> : vector<64x64xf32>
    %22 = tpu.matmul %20, %21, %cst_12 {dimension_numbers = #tpu.dot_dimension_numbers<[1], [1], [0], [0], [0, 0, 1, 0], [], []>} : vector<64x128xbf16>, vector<64x128xbf16>, vector<64x64xf32> -> vector<64x64xf32>
    %cst_13 = arith.constant dense<0xFF800000> : vector<64xf32>
    %23 = vector.multi_reduction <maximumf>, %22, %cst_13 [1] : vector<64x64xf32> to vector<64xf32>
    %24 = vector.shape_cast %23 : vector<64xf32> to vector<64x1xf32>
    %25 = vector.broadcast %24 : vector<64x1xf32> to vector<64x64xf32>
    %26 = arith.subf %22, %25 : vector<64x64xf32>
    %27 = arith.truncf %26 : vector<64x64xf32> to vector<64x64xbf16>
    %28 = math.exp %27 : vector<64x64xbf16>
    %c0_14 = arith.constant 0 : index
    %c0_15 = arith.constant 0 : index
    %29 = vector.load %arg17[%c0_14, %c0_15] : memref<64x128xbf16, #tpu.memory_space<vmem>>, vector<64x128xbf16>
    %cst_16 = arith.constant dense<0.000000e+00> : vector<64x128xf32>
    %30 = tpu.matmul %28, %29, %cst_16 {dimension_numbers = #tpu.dot_dimension_numbers<[1], [0], [0], [1], [0, 0, 1, 1], [], []>} : vector<64x64xbf16>, vector<64x128xbf16>, vector<64x128xf32> -> vector<64x128xf32>
    %31 = vector.extract_strided_slice %30 {offsets = [0, 64], sizes = [64, 1], strides = [1, 1]} : vector<64x128xf32> to vector<64x1xf32>
    %32 = tpu.reciprocal %31 {approx = true} : vector<64x1xf32> -> vector<64x1xf32>
    %33 = arith.truncf %30 : vector<64x128xf32> to vector<64x128xbf16>
    %c0_17 = arith.constant 0 : index
    %c0_18 = arith.constant 0 : index
    %34 = vector.load %arg11[%c0_17, %c0_18] : memref<128x128xbf16, #tpu.memory_space<vmem>>, vector<128x128xbf16>
    %cst_19 = arith.constant dense<0.000000e+00> : vector<64x128xf32>
    %35 = tpu.matmul %33, %34, %cst_19 {dimension_numbers = #tpu.dot_dimension_numbers<[1], [0], [0], [1], [0, 0, 1, 1], [], []>} : vector<64x128xbf16>, vector<128x128xbf16>, vector<64x128xf32> -> vector<64x128xf32>
    %36 = vector.broadcast %32 : vector<64x1xf32> to vector<64x128xf32>
    %37 = arith.mulf %35, %36 : vector<64x128xf32>
    %c0_20 = arith.constant 0 : index
    %c0_21 = arith.constant 0 : index
    %38 = vector.load %arg12[%c0_20, %c0_21] : memref<1x128xf32, #tpu.memory_space<vmem>>, vector<1x128xf32>
    %39 = vector.broadcast %38 : vector<1x128xf32> to vector<64x128xf32>
    %40 = arith.addf %37, %39 : vector<64x128xf32>
    %41 = arith.addf %7, %40 : vector<64x128xf32>
    %c0_22 = arith.constant 0 : index
    %c0_23 = arith.constant 0 : index
    %c0_24 = arith.constant 0 : index
    %42 = vector.load %arg13[%c0_22, %c0_23, %c0_24] : memref<1x64x128xf32, #tpu.memory_space<vmem>>, vector<1x64x128xf32>
    %43 = vector.shape_cast %42 : vector<1x64x128xf32> to vector<64x128xf32>
    %44 = vector.shape_cast %41 : vector<64x128xf32> to vector<1x64x128xf32>
    tpu.vector_store %arg13[%c0_22, %c0_23, %c0_24], %44 {strides = array<i32>} : memref<1x64x128xf32, #tpu.memory_space<vmem>>, vector<1x64x128xf32>,
    return
  }
  func.func @transform_0(%arg0: i32, %arg1: i32) -> (i32, i32, i32) {
    %c0_i32 = arith.constant 0 : i32
    %c0_i32_0 = arith.constant 0 : i32
    %c0_i32_1 = arith.constant 0 : i32
    return %arg0, %c0_i32, %c0_i32_0 : i32, i32, i32
  }
  func.func @transform_1(%arg0: i32, %arg1: i32) -> (i32, i32) {
    %c0_i32 = arith.constant 0 : i32
    %c0_i32_0 = arith.constant 0 : i32
    %c0_i32_1 = arith.constant 0 : i32
    return %c0_i32, %c0_i32_0 : i32, i32
  }
  func.func @transform_2(%arg0: i32, %arg1: i32) -> (i32, i32) {
    %c0_i32 = arith.constant 0 : i32
    %c0_i32_0 = arith.constant 0 : i32
    %c0_i32_1 = arith.constant 0 : i32
    return %c0_i32, %c0_i32_0 : i32, i32
  }
  func.func @transform_3(%arg0: i32, %arg1: i32) -> (i32, i32) {
    %c0_i32 = arith.constant 0 : i32
    %c0_i32_0 = arith.constant 0 : i32
    %c0_i32_1 = arith.constant 0 : i32
    return %c0_i32, %c0_i32_0 : i32, i32
  }
  func.func @transform_4(%arg0: i32, %arg1: i32) -> (i32, i32) {
    %c0_i32 = arith.constant 0 : i32
    %c0_i32_0 = arith.constant 0 : i32
    %c0_i32_1 = arith.constant 0 : i32
    return %c0_i32, %c0_i32_0 : i32, i32
  }
  func.func @transform_5(%arg0: i32, %arg1: i32) -> (i32, i32) {
    %c0_i32 = arith.constant 0 : i32
    %c0_i32_0 = arith.constant 0 : i32
    %c0_i32_1 = arith.constant 0 : i32
    return %c0_i32, %c0_i32_0 : i32, i32
  }
  func.func @transform_6(%arg0: i32, %arg1: i32) -> (i32, i32) {
    %c0_i32 = arith.constant 0 : i32
    %c0_i32_0 = arith.constant 0 : i32
    %c0_i32_1 = arith.constant 0 : i32
    return %c0_i32, %c0_i32_0 : i32, i32
  }
  func.func @transform_7(%arg0: i32, %arg1: i32) -> (i32, i32) {
    %c0_i32 = arith.constant 0 : i32
    %c0_i32_0 = arith.constant 0 : i32
    %c0_i32_1 = arith.constant 0 : i32
    return %c0_i32, %c0_i32_0 : i32, i32
  }
  func.func @transform_8(%arg0: i32, %arg1: i32) -> (i32, i32) {
    %c0_i32 = arith.constant 0 : i32
    %c0_i32_0 = arith.constant 0 : i32
    %c0_i32_1 = arith.constant 0 : i32
    return %c0_i32, %c0_i32_0 : i32, i32
  }
  func.func @transform_9(%arg0: i32, %arg1: i32) -> (i32, i32) {
    %c0_i32 = arith.constant 0 : i32
    %c0_i32_0 = arith.constant 0 : i32
    %c0_i32_1 = arith.constant 0 : i32
    return %c0_i32, %c0_i32_0 : i32, i32
  }
  func.func @transform_10(%arg0: i32, %arg1: i32) -> (i32, i32) {
    %c0_i32 = arith.constant 0 : i32
    %c0_i32_0 = arith.constant 0 : i32
    %c0_i32_1 = arith.constant 0 : i32
    return %c0_i32, %c0_i32_0 : i32, i32
  }
  func.func @transform_11(%arg0: i32, %arg1: i32) -> (i32, i32, i32) {
    %c0_i32 = arith.constant 0 : i32
    %c0_i32_0 = arith.constant 0 : i32
    return %arg0, %arg1, %c0_i32 : i32, i32, i32
  }
}

</mosaic_0001>

<bundles_post_ra>
// kernel: tpu_custom_call.1
= control target key start
LH: loop header
LB: loop body
LE: loop exit
PB: predicated region body
PF: predicated region fallthrough
CT: control target
= control target key end

     0   :  { %s2533_s0 = inlined_call_operand.vmem [shape: f32[2,64,128], index: 0, kind: input, shape index: {}]   ;;  %s2534_s1 = inlined_call_operand.hbm [shape: f32[1,128], index: 1, kind: input, shape index: {}]   ;;  %s2535_s2 = inlined_call_operand.vmem [shape: f32[1,128], index: 2, kind: input, shape index: {}]   ;;  %s2536_s3 = inlined_call_operand.vmem [shape: f32[128,32], index: 3, kind: input, shape index: {}]   ;;  %s2537_s4 = inlined_call_operand.vmem [shape: f32[32,128], index: 4, kind: input, shape index: {}]   ;;  %s2538_s5 = inlined_call_operand.hbm [shape: bf16[128,128], index: 5, kind: input, shape index: {}]   ;;  %s2539_s6 = inlined_call_operand.vmem [shape: f32[1,128], index: 6, kind: input, shape index: {}]   ;;  %s2540_s7 = inlined_call_operand.hbm [shape: bf16[128,256], index: 7, kind: input, shape index: {}]   ;;  %s2541_s8 = inlined_call_operand.vmem [shape: f32[1,256], index: 8, kind: input, shape index: {}]   ;;  %s2542_s9 = inlined_call_operand.hbm [shape: bf16[128,128], index: 9, kind: input, shape index: {}]   ;;  %s2543_s10 = inlined_call_operand.vmem [shape: f32[1,128], index: 10, kind: input, shape index: {}]   ;;  %s2544_s11 = inlined_call_operand.hbm [shape: f32[2,64,128], index: 11, kind: output, shape index: {}]  }
   0x1   :  { %2554 = sst [smem:[#allocation27_spill]] %s2534_s1 }
   0x2   :  { %2555 = sst [smem:[#allocation28_spill]] %s2538_s5 }
   0x3   :  { %16 = vsyncpa [#allocation7], 0 }
   0x4   :  { %17 = vsyncpa [#allocation10], 0 }
   0x5   :  { %18 = vsyncpa [#allocation13], 0 }
   0x6   :  { %19 = vsyncpa [#allocation8], 0 }
   0x7   :  { %21 = vsyncpa [#allocation8 + $0x1], 0  ;;  %s2207_s17 = smov 0   ;;  %s2209_s18 = smov 0  }
   0x8   :  { %s2211_s19 = smov 0   ;;  %s2213_s20 = smov 0  }
   0x9   :  { %s2215_s21 = smov 0   ;;  %s2217_s22 = smov 0  }
   0xa LB: > { %2556 = sst [smem:[#allocation19_spill]] %s2114_s17  ;;  %s1487_s23 = sadd.s32 4294967295, %s2134_s22   ;;  %s2134_s22 = sphi %s2217_s22, %s27_s22   ;;  %s2130_s21 = sphi %s2215_s21, %s2578_s21   ;;  %s2126_s20 = sphi %s2213_s20, %s2577_s20   ;;  %s2122_s19 = sphi %s2211_s19, %s2581_s19   ;;  %s2118_s18 = sphi %s2209_s18, %s2580_s18   ;;  %s2114_s17 = sphi %s2207_s17, %s2579_s17  }
   0xb   : > { %2557 = sst [smem:[#allocation20_spill]] %s2122_s19  ;;  %s1488_s24 = sadd.s32 4294967294, %s2134_s22  }
   0xc   : > { %2558 = sst [smem:[#allocation21_spill]] %s2130_s21  ;;  %s39_s25 = sadd.s32 1, %s2130_s21 }
   0xd   : > { %2559 = sst [smem:[#allocation22_spill]] %s2134_s22  ;;  %s284_s26 = sadd.s32 1, %s2122_s19 }
   0xe   : > { %p41_p0 = scmp.ge.s32.totalorder %s39_s25, 2  ;;  %p294_p1 = scmp.ne.s32.totalorder %s2122_s19, %s2118_s18 }
   0xf   : > { %p295_p2 = scmp.eq.s32.totalorder %s1487_s23, 1  ;;  %p300_p3 = scmp.ne.s32.totalorder %s2118_s18, %s2114_s17 }
  0x10   : > { %s2583_s25 = smov (%p41_p0, %s39_s25), 0  ;;  %p301_p5 = scmp.eq.s32.totalorder %s1488_s24, 1 }
  0x11   : > { %2560 = sst [smem:[#allocation23_spill]] %s2583_s25  ;;  %p2247_p4 = por %p295_p2, %p294_p1 }
  0x12   : > { %s279_s28 = ssub.s32 %s2130_s21, %s2583_s25  ;;  %p1489_p6 = scmp.ge.s32.totalorder %s2134_s22, 1 }
  0x13   : > { %s2561_s27 = scalar_select %p2247_p4, 1, 0 }
  0x14   : > { %p282_p7 = scmp.eq.s32.totalorder %s279_s28, 0  ;;  %p2254_p8 = por %p301_p5, %p300_p3 }
  0x15   : > { %2562 = sst [smem:[#allocation24_spill]] %s2561_s27  ;;  %p308_p9 = scmp.lt.s32.totalorder %s2134_s22, 3 }
  0x16   : > { %s2563_s29 = scalar_select %p2254_p8, 1, 0 }
  0x17   : > { %s2260_s30 = scalar_select %p282_p7, %s2122_s19, %s284_s26  }
  0x18   : > { %2564 = sst [smem:[#allocation25_spill]] %s2563_s29  ;;  %p2262_p10 = pnand %p1489_p6, %p308_p9 }
  0x19   : > { %2565 = sst [smem:[#allocation26_spill]] %s2260_s30  ;;  %p2266_p11 = scmp.eq.s32.totalorder %s1487_s23, 0 }
  0x1a   : > { %s2568_s5 = sld [smem:[#allocation28_spill]]  ;;  %p1791_p12 = pneg %p2262_p10 }
  0x1b   : > { %s2136_s24 = smov [#allocation9]   ;;  %s2137_s23 = smov 64  }
  0x1c   : > { %s342_s26 = sshll.u32 %s2136_s24, 4  ;;  %p2277_p13 = pnand %p2266_p11, %p1791_p12  ;;  %s343_s26 = int_to_ptr.vmem [resolvable:$true] %s342_s26 }
  0x1d   : > { %s2138_s25 = smov 4   ;;  %s2570_s1 = sld [smem:[#allocation27_spill]] }
  0x1e   : > { %s2139_s21 = smov [#allocation6]   ;;  %s357_s29 = sshll.u32 %s2540_s7, 4  ;;  %s358_s29 = int_to_ptr.hbm [resolvable:$true] %s357_s29 }
  0x1f   : > { %s322_s24 = sshll.u32 %s2139_s21, 4  ;;  %s2140_s17 = smov [#allocation11]   ;;  %s323_s24 = int_to_ptr.vmem [resolvable:$true] %s322_s24 }
  0x20   : > { %s340_s16 = sshll.u32 %s2568_s5, 4  ;;  %s359_s22 = sshll.u32 %s2140_s17, 4  ;;  %s341_s16 = int_to_ptr.hbm [resolvable:$true] %s340_s16  ;;  %s360_s22 = int_to_ptr.vmem [resolvable:$true] %s359_s22 }
  0x21   : > { %1797 = dma.hbm_to_vmem [thread:$0]  (!%p2277_p13), %s341_s16, 1024, %s343_s26, [#allocation10], %s2137_s23, %s2137_s23, %s2138_s25  }
  0x22   : > { %s2141_s16 = smov 128   ;;  %s2142_s26 = smov 8  }
  0x23   : > { %s320_s5 = sshll.u32 %s2570_s1, 4  ;;  %s374_s21 = sshll.u32 %s2542_s9, 4  ;;  %s321_s5 = int_to_ptr.hbm [resolvable:$true] %s320_s5  ;;  %s375_s21 = int_to_ptr.hbm [resolvable:$true] %s374_s21 }
  0x24   : > { %1794 = dma.hbm_to_vmem [thread:$0]  (!%p2277_p13), %s321_s5, 16, %s323_s24, [#allocation7]  }
  0x25   : > { %1800 = dma.hbm_to_vmem [thread:$0]  (!%p2277_p13), %s358_s29, 2048, %s360_s22, [#allocation10], %s2141_s16, %s2141_s16, %s2142_s26  }
  0x26   : > { %s2143_s1 = smov [#allocation12]   ;;  %403 = sbr.rel (%p2262_p10) target bundleno = 1221 (0x4c5), region = 64 }
  0x27   : > { %s376_s27 = sshll.u32 %s2143_s1, 4  ;;  %s377_s27 = int_to_ptr.vmem [resolvable:$true] %s376_s27 }
  0x28   : > { %1803 = dma.hbm_to_vmem [thread:$0]  (!%p2277_p13), %s375_s21, 1024, %s377_s27, [#allocation13], %s2137_s23, %s2137_s23, %s2138_s25  }
  0x2b   : > { %2097 = dma.done.wait (%p2266_p11), [#allocation7], 16  }
  0x2c   : > { %2099 = vsyncadd (%p2266_p11), [#allocation7], 4294967280 }
  0x2d   : > { %2101 = dma.done.wait (%p2266_p11), [#allocation10], 3072  }
  0x2e   : > { %2103 = vsyncadd (%p2266_p11), [#allocation10], 4294964224 }
  0x2f   : > { %2105 = dma.done.wait (%p2266_p11), [#allocation13], 1024  }
  0x30   : > { %2107 = vsyncadd (%p2266_p11), [#allocation13], 4294966272  ;;  %p459_p0 = scmp.lt.s32.totalorder %s2126_s20, 1  ;;  %v529_v0 = vld [vmem:[%s2536_s3 + $0x78] sm:$0xff]  ;;  %v528_v1 = vld [vmem:[%s2536_s3 + $0x70] sm:$0xff]  ;;  %vm512_vm0 = vcmask 1040384  }
  0x31   : > { %530 = vmatpush.msra.mxu0 %v529_v0  ;;  %v527_v2 = vld [vmem:[%s2536_s3 + $0x68] sm:$0xff]  ;;  %v526_v3 = vld [vmem:[%s2536_s3 + $0x60] sm:$0xff]  ;;  %v525_v6 = vld [vmem:[%s2536_s3 + $0x58] sm:$0xff]  ;;  %vm562_vm1 = vcmask 261120   ;;  %vm1034_vm5 = vcmask 523264   ;;  %s456_s26 = sand.u32 1, %s2118_s18  }
  0x32   : > { %s460_s1 = scalar_select %p459_p0, %s2126_s20, 1  ;;  %v524_v12 = vld [vmem:[%s2536_s3 + $0x50] sm:$0xff]  ;;  %v523_v18 = vld [vmem:[%s2536_s3 + $0x48] sm:$0xff]  ;;  %v522_v23 = vld [vmem:[%s2536_s3 + $0x40] sm:$0xff] }
  0x33   : > { %531 = vmatpush.msra.mxu0 %v528_v1  ;;  %v521_v28 = vld [vmem:[%s2536_s3 + $0x38] sm:$0xff]  ;;  %v520_v33 = vld [vmem:[%s2536_s3 + $0x30] sm:$0xff]  ;;  %v519_v37 = vld [vmem:[%s2536_s3 + $0x28] sm:$0xff]  ;;  %s1500_s21 = sshll.u32 %s456_s26, 6  ;;  %s2064_s24 = scalar_lea.hbm %s2544_s11, 128 }
  0x34   : > { %s1673_s5 = sshll.u32 %s460_s1, 6  ;;  %v518_v40 = vld [vmem:[%s2536_s3 + $0x20] sm:$0xff]  ;;  %v517_v43 = vld [vmem:[%s2536_s3 + $0x18] sm:$0xff]  ;;  %v516_v46 = vld [vmem:[%s2536_s3 + $0x10] sm:$0xff]  ;;  %s2477_s1 = scalar_lea.vmem [#allocation14], %s1500_s21 }
  0x35   : > { %s2326_s13 = scalar_lea.vmem %s2533_s0, %s1673_s5  ;;  %532 = vmatpush.msra.mxu0 %v527_v2  ;;  %v515_v49 = vld [vmem:[%s2536_s3 + $0x8] sm:$0xff]  ;;  %v514_v52 = vld [vmem:[%s2536_s3] sm:$0xff]  ;;  %v561_v59 = vld [vmem:[%s2537_s4 + $0x18] sm:$0xff]  ;;  %s1714_s5 = sshll.u32 %s2126_s20, 6 }
  0x36   : > { %v2332_v4 = vld [vmem:[%s2326_s13] sm:$0xff]  ;;  %v2335_v5 = vld [vmem:[%s2326_s13 + $0x8] sm:$0xff]  ;;  %v2341_v7 = vld [vmem:[%s2326_s13 + $0x10] sm:$0xff]  ;;  %s1367_s22 = scalar_lea.hbm %s2544_s11, %s1714_s5  ;;  %s1368_s27 = sshll.u32 %s2477_s1, 4  ;;  %s1369_s27 = int_to_ptr.vmem [resolvable:$true] %s1368_s27 }
  0x37   : > { %v2344_v8 = vld [vmem:[%s2326_s13 + $0x18] sm:$0xff]  ;;  %v478_v9 = vadd.f32 %v2335_v5, %v2332_v4  ;;  %v491_v10 = vmul.f32 %v2332_v4, %v2332_v4  ;;  %v492_v11 = vmul.f32 %v2335_v5, %v2335_v5  ;;  %533 = vmatpush.msra.mxu0 %v526_v3  ;;  %v2356_v13 = vld [vmem:[%s2326_s13 + $0x20] sm:$0xff]  ;;  %v493_v14 = vmul.f32 %v2341_v7, %v2341_v7  ;;  %v2367_v19 = vld [vmem:[%s2326_s13 + $0x28] sm:$0xff]  ;;  %s1370_s29 = sshll.u32 %s1367_s22, 4  ;;  %s1354_s20 = scalar_lea.sflag [#allocation8], %s456_s26  ;;  %s1371_s29 = int_to_ptr.hbm [resolvable:$true] %s1370_s29 }
  0x38   : > { %v494_v16 = vmul.f32 %v2344_v8, %v2344_v8  ;;  %v495_v21 = vmul.f32 %v2356_v13, %v2356_v13  ;;  %v2376_v24 = vld [vmem:[%s2326_s13 + $0x30] sm:$0xff]  ;;  %v496_v26 = vmul.f32 %v2367_v19, %v2367_v19  ;;  %v2385_v29 = vld [vmem:[%s2326_s13 + $0x38] sm:$0xff]  ;;  %v559_v61 = vld [vmem:[%s2537_s4 + $0x8] sm:$0xff]  ;;  %s2058_s30 = sshra.s32 %s1371_s29, 4  ;;  %s2059_s30 = int_to_ptr.hbm [resolvable:$true] %s2058_s30 }
  0x39   : > { %v479_v15 = vadd.f32 %v478_v9, %v2341_v7  ;;  %534 = vmatpush.msra.mxu0 %v525_v6  ;;  %v499_v17 = vadd.f32 %v492_v11, %v491_v10  ;;  %v497_v31 = vmul.f32 %v2376_v24, %v2376_v24  ;;  %v498_v35 = vmul.f32 %v2385_v29, %v2385_v29  ;;  %v560_v60 = vld [vmem:[%s2537_s4 + $0x10] sm:$0xff]  ;;  %v558_v62 = vld [vmem:[%s2537_s4] sm:$0xff]  ;;  %v1689_v11 = vld [vmem:[#allocation11 + $0x74] sm:$0xf0]  ;;  %s2060_s12 = scalar_lea.hbm %s2059_s30, 64  ;;  %p2065_p5 = scmp.lt.s32.totalorder %s2059_s30, %s2544_s11 }
  0x3a   : > { %v1562_v10 = vld [vmem:[#allocation11 + $0x70] sm:$0xf]  ;;  %p2061_p1 = scmp.ne.s32.totalorder %s2059_s30, %s2060_s12  ;;  %p2066_p6 = scmp.lt.s32.totalorder %s2064_s24, %s2060_s12 }
  0x3b   : > { %v480_v20 = vadd.f32 %v479_v15, %v2344_v8  ;;  %535 = vmatpush.msra.mxu0 %v524_v12  ;;  %v500_v22 = vadd.f32 %v499_v17, %v493_v14  ;;  %v1688_v12 = vld [vmem:[#allocation11 + $0x74] sm:$0xf]  ;;  %v1563_v14 = vor.u32 %v1689_v11, %v1562_v10  ;;  %v1564_v15 = vld [vmem:[#allocation11 + $0x78] sm:$0xf0]  ;;  %v1554_v17 = vld [vmem:[#allocation11 + $0x60] sm:$0xf] }
  0x3c   : > { %v1694_v10 = vld [vmem:[#allocation9 + $0x20] sm:$0xff]  ;;  %p2062_p2 = pnand %p2061_p1, %p2247_p4  ;;  %p2067_p7 = por %p2066_p6, %p2065_p5 }
  0x3d   : > { %v481_v25 = vadd.f32 %v480_v20, %v2356_v13  ;;  %536 = vmatpush.msra.mxu0 %v523_v18  ;;  %v501_v27 = vadd.f32 %v500_v22, %v494_v16  ;;  %v1567_v16 = vor.u32 %v1688_v12, %v1564_v15  ;;  %744 = vmatpush.bf16.msra.mxu2 %v1563_v14  ;;  %v1687_v18 = vld [vmem:[#allocation11 + $0x64] sm:$0xf0]  ;;  %v1686_v20 = vld [vmem:[#allocation11 + $0x64] sm:$0xf]  ;;  %v1556_v22 = vld [vmem:[#allocation11 + $0x68] sm:$0xf0] }
  0x3e   : > { %v1879_v14 = vld [vmem:[#allocation6] ss:$0 sm:$0xff]  ;;  %p2063_p3 = pneg %p2062_p2 }
  0x3f   : > { %v482_v30 = vadd.f32 %v481_v25, %v2367_v19  ;;  %537 = vmatpush.msra.mxu0 %v522_v23  ;;  %v502_v32 = vadd.f32 %v501_v27, %v495_v21  ;;  %773 = vmatpush.bf16.msra.mxu1 %v1567_v16  ;;  %v1555_v21 = vor.u32 %v1687_v18, %v1554_v17  ;;  %v1546_v25 = vld [vmem:[#allocation11 + $0x50] sm:$0xf]  ;;  %v1684_v27 = vld [vmem:[#allocation11 + $0x54] sm:$0xf]  ;;  %v1693_v17 = vld [vmem:[#allocation9 + $0x18] sm:$0xff] }
  0x40   : > { %1761 = vmatpush.bf16.msra.mxu3 %v1567_v16  ;;  %v1559_v23 = vor.u32 %v1686_v20, %v1556_v22  ;;  %v1692_v20 = vld [vmem:[#allocation9 + $0x10] sm:$0xff]  ;;  %v602_v22 = vld [vmem:[%s2535_s2] sm:$0x1]  ;;  %p2068_p9 = pnand %p2067_p7, %p2063_p3 }
  0x41   : > { %v483_v34 = vadd.f32 %v482_v30, %v2376_v24  ;;  %538 = vmatpush.msra.mxu0 %v521_v28  ;;  %v503_v36 = vadd.f32 %v502_v32, %v496_v26  ;;  %745 = vmatpush.bf16.msra.mxu2 %v1555_v21  ;;  %v1685_v26 = vld [vmem:[#allocation11 + $0x54] sm:$0xf0]  ;;  %v1548_v30 = vld [vmem:[#allocation11 + $0x58] sm:$0xf0]  ;;  %v1538_v32 = vld [vmem:[#allocation11 + $0x40] sm:$0xf] }
  0x42   : > { %v1547_v28 = vor.u32 %v1685_v26, %v1546_v25  ;;  %v1691_v26 = vld [vmem:[#allocation9 + $0x8] sm:$0xff] }
  0x43   : > { %v484_v38 = vadd.f32 %v483_v34, %v2385_v29  ;;  %539 = vmatpush.msra.mxu0 %v520_v33  ;;  %v504_v39 = vadd.f32 %v503_v36, %v497_v31  ;;  %774 = vmatpush.bf16.msra.mxu1 %v1559_v23  ;;  %v1551_v31 = vor.u32 %v1684_v27, %v1548_v30  ;;  %v1683_v33 = vld [vmem:[#allocation11 + $0x44] sm:$0xf0]  ;;  %v1682_v34 = vld [vmem:[#allocation11 + $0x44] sm:$0xf]  ;;  %v1540_v36 = vld [vmem:[#allocation11 + $0x48] sm:$0xf0] }
  0x44   : > { %1762 = vmatpush.bf16.msra.mxu3 %v1559_v23 }
  0x45   : > { %v485_v41 = vrot.slane %v484_v38, 4  ;;  %540 = vmatpush.msra.mxu0 %v519_v37  ;;  %v505_v42 = vadd.f32 %v504_v39, %v498_v35  ;;  %746 = vmatpush.bf16.msra.mxu2 %v1547_v28  ;;  %v1539_v35 = vor.u32 %v1683_v33, %v1538_v32  ;;  %v1543_v37 = vor.u32 %v1682_v34, %v1540_v36  ;;  %v1681_v39 = vld [vmem:[#allocation11 + $0x34] sm:$0xf0]  ;;  %v1690_v34 = vld [vmem:[#allocation9] sm:$0xff] }
  0x47   : > { %v486_v44 = vadd.f32 %v485_v41, %v484_v38  ;;  %541 = vmatpush.msra.mxu0 %v518_v40  ;;  %v506_v45 = vrot.slane %v505_v42, 4  ;;  %775 = vmatpush.bf16.msra.mxu1 %v1551_v31  ;;  %v1530_v38 = vld [vmem:[#allocation11 + $0x30] sm:$0xf]  ;;  %v1680_v40 = vld [vmem:[#allocation11 + $0x34] sm:$0xf] }
  0x48   : > { %1763 = vmatpush.bf16.msra.mxu3 %v1551_v31  ;;  %v1531_v41 = vor.u32 %v1681_v39, %v1530_v38 }
  0x49   : > { %v487_v47 = vrot.slane %v486_v44, 2  ;;  %542 = vmatpush.msra.mxu0 %v517_v43  ;;  %v507_v48 = vadd.f32 %v506_v45, %v505_v42  ;;  %747 = vmatpush.bf16.msra.mxu2 %v1539_v35  ;;  %v1532_v42 = vld [vmem:[#allocation11 + $0x38] sm:$0xf0]  ;;  %v1679_v45 = vld [vmem:[#allocation11 + $0x24] sm:$0xf0] }
  0x4a   : > { %v1535_v43 = vor.u32 %v1680_v40, %v1532_v42 }
  0x4b   : > { %v488_v50 = vadd.f32 %v487_v47, %v486_v44  ;;  %543 = vmatpush.msra.mxu0 %v516_v46  ;;  %v508_v51 = vrot.slane %v507_v48, 2  ;;  %776 = vmatpush.bf16.msra.mxu1 %v1543_v37  ;;  %v1522_v44 = vld [vmem:[#allocation11 + $0x20] sm:$0xf]  ;;  %v1678_v47 = vld [vmem:[#allocation11 + $0x24] sm:$0xf] }
  0x4c   : > { %1764 = vmatpush.bf16.msra.mxu3 %v1543_v37  ;;  %v1523_v46 = vor.u32 %v1679_v45, %v1522_v44 }
  0x4d   : > { %v489_v53 = vrot.slane %v488_v50, 1  ;;  %544 = vmatpush.msra.mxu0 %v515_v49  ;;  %v509_v54 = vadd.f32 %v508_v51, %v507_v48  ;;  %748 = vmatpush.bf16.msra.mxu2 %v1531_v41  ;;  %v1524_v48 = vld [vmem:[#allocation11 + $0x28] sm:$0xf0]  ;;  %v1677_v51 = vld [vmem:[#allocation11 + $0x14] sm:$0xf0] }
  0x4e   : > { %v1527_v49 = vor.u32 %v1678_v47, %v1524_v48 }
  0x4f   : > { %545 = vmatpush.msra.mxu0 %v514_v52  ;;  %v490_v55 = vadd.f32 %v489_v53, %v488_v50  ;;  %v510_v56 = vrot.slane %v509_v54, 1  ;;  %777 = vmatpush.bf16.msra.mxu1 %v1535_v43  ;;  %v1514_v50 = vld [vmem:[#allocation11 + $0x10] sm:$0xf]  ;;  %v1676_v52 = vld [vmem:[#allocation11 + $0x14] sm:$0xf] }
  0x50   : > { %1765 = vmatpush.bf16.msra.mxu3 %v1535_v43  ;;  %v1515_v53 = vor.u32 %v1677_v51, %v1514_v50 }
  0x51   : > { %v511_v57 = vadd.f32 %v510_v56, %v509_v54  ;;  %578 = vmatpush.msrb.mxu0 %v561_v59  ;;  %749 = vmatpush.bf16.msra.mxu2 %v1523_v46  ;;  %v1516_v54 = vld [vmem:[#allocation11 + $0x18] sm:$0xf0]  ;;  %v1506_v56 = vld [vmem:[#allocation11] sm:$0xf] }
  0x53   : > { %v513_v58 = vsel %vm512_vm0, %v490_v55, %v511_v57  ;;  %579 = vmatpush.msrb.mxu0 %v560_v60  ;;  %778 = vmatpush.bf16.msra.mxu1 %v1527_v49  ;;  %v1519_v55 = vor.u32 %v1676_v52, %v1516_v54  ;;  %v1675_v57 = vld [vmem:[#allocation11 + $0x4] sm:$0xf0]  ;;  %v1508_v60 = vld [vmem:[#allocation11 + $0x8] sm:$0xf0] }
  0x54   : > { %546 = vmatmul.f32.vlgmr.msra.gmra.mxu0 %v513_v58  ;;  %1766 = vmatpush.bf16.msra.mxu3 %v1527_v49  ;;  %v1674_v58 = vld [vmem:[#allocation11 + $0x4] sm:$0xf]  ;;  %v1507_v59 = vor.u32 %v1675_v57, %v1506_v56 }
  0x55   : > { %580 = vmatpush.msrb.mxu0 %v559_v61  ;;  %750 = vmatpush.bf16.msra.mxu2 %v1515_v53  ;;  %v1511_v61 = vor.u32 %v1674_v58, %v1508_v60 }
  0x57   : > { %581 = vmatpush.msrb.mxu0 %v558_v62  ;;  %779 = vmatpush.bf16.msra.mxu1 %v1519_v55 }
  0x58   : > { %1767 = vmatpush.bf16.msra.mxu3 %v1519_v55 }
  0x59   : > { %751 = vmatpush.bf16.msra.mxu2 %v1507_v59 }
  0x5b   : > { %780 = vmatpush.bf16.msra.mxu1 %v1511_v61 }
  0x5c   : > { %1768 = vmatpush.bf16.msra.mxu3 %v1511_v61 }
  0xd1   : > { %v547_v63 = vpop.f32.mrf.mxu0 }
  0xd2   : > { %v550_v0 = vmul.f32 0.0078125, %v547_v63 }
  0xd4   : > { %v551_v1 = vmul.f32 %v550_v0, %v550_v0 }
  0xd6   : > { %v553_v2 = vrot.slane %v551_v1, 7  ;;  %v1696_v1 = vld [vmem:[#allocation9 + $0x30] sm:$0xff] }
  0xd8   : > { %v555_v3 = vsub.f32 %v550_v0, %v553_v2 }
  0xda   : > { %v556_v6 = vmax.f32 %v555_v3, 0.0  ;;  %v1695_v3 = vld [vmem:[#allocation9 + $0x28] sm:$0xff] }
  0xdc   : > { %v557_v9 = vsel %vm512_vm0, %v550_v0, %v556_v6  ;;  %v1697_v0 = vld [vmem:[#allocation9 + $0x38] sm:$0xff] }
  0xdd   : > { %1503 = vmatmul.msk.f32.vlgmr.msrb.gmra.mxu0 %vm562_vm1, %v557_v9  ;;  %940 = vmatpush.bf16.msrb.mxu1 %v1697_v0 }
  0xe1   : > { %941 = vmatpush.bf16.msrb.mxu1 %v1696_v1 }
  0xe5   : > { %942 = vmatpush.bf16.msrb.mxu1 %v1695_v3 }
  0xe9   : > { %943 = vmatpush.bf16.msrb.mxu1 %v1694_v10 }
  0xed   : > { %944 = vmatpush.bf16.msrb.mxu1 %v1693_v17 }
  0xf1   : > { %945 = vmatpush.bf16.msrb.mxu1 %v1692_v20 }
  0xf5   : > { %946 = vmatpush.bf16.msrb.mxu1 %v1691_v26 }
  0xf9   : > { %947 = vmatpush.bf16.msrb.mxu1 %v1690_v34 }
 0x15a   : > { %v583_v62 = vpop.f32.mrf.mxu0 }
 0x15b   : > { %v586_v63 = vadd.f32 1e-05, %v583_v62 }
 0x15d   : > { %1884 = vrsqrt.f32 %v586_v63  ;;  %vm593_vm3 = vweird.f32 %v586_v63 }
 0x163   : > { %v1885_v2 = vpop.eup %1884 }
 0x164   : > { %v588_v6 = vmul.f32 %v1885_v2, %v586_v63  ;;  %vm594_vm2 = vweird.f32 %v1885_v2 }
 0x165   : > { %vm595_vm4 = vmor %vm593_vm3, %vm594_vm2 }
 0x166   : > { %v589_v9 = vmul.f32 %v1885_v2, %v588_v6 }
 0x168   : > { %v590_v11 = vmul.f32 0.5, %v589_v9 }
 0x16a   : > { %v591_v12 = vsub.f32 1.5, %v590_v11 }
 0x16c   : > { %v592_v15 = vmul.f32 %v1885_v2, %v591_v12  ;;  %v658_v12 = vld [vmem:[%s2541_s8] sm:$0x3] }
 0x16e   : > { %v596_v16 = vsel %vm595_vm4, %v1885_v2, %v592_v15 }
 0x16f   : > { %v601_v18 = vmul.f32 %v1879_v14, %v596_v16 }
 0x171   : > { %v604_v21 = vrot.slane %v601_v18, 1  ;;  %608 = vst [vmem:[#allocation2 - $0x1] sm:$0x2] %v601_v18  ;;  %v618_v23 = vperm.slane %v601_v18, 1  ;;  %v660_v18 = vperm.slane %v658_v12, 0 }
 0x173   : > { %v606_v25 = vmul.f32 %v604_v21, %v583_v62  ;;  %v619_v28 = vmul.f32 %v618_v23, %v2332_v4  ;;  %v620_v31 = vmul.f32 %v618_v23, %v2335_v5  ;;  %v623_v32 = vmul.f32 %v618_v23, %v2356_v13 }
 0x174   : > { %v624_v33 = vmul.f32 %v618_v23, %v2367_v19  ;;  %v621_v41 = vmul.f32 %v618_v23, %v2341_v7  ;;  %v622_v42 = vmul.f32 %v618_v23, %v2344_v8  ;;  %v625_v43 = vmul.f32 %v618_v23, %v2376_v24 }
 0x175   : > { %v607_v27 = vsub.f32 %v602_v22, %v606_v25  ;;  %v626_v44 = vmul.f32 %v618_v23, %v2385_v29 }
 0x177   : > { %609 = vst [vmem:[#allocation3] sm:$0x1] %v607_v27  ;;  %v628_v30 = vperm.slane %v607_v27, 0 }
 0x178   : > { %v1880_v51 = vld [vmem:[#allocation2] ss:$0 sm:$0xff] }
 0x179   : > { %v630_v35 = vadd.f32 %v628_v30, %v619_v28  ;;  %v631_v36 = vadd.f32 %v628_v30, %v620_v31  ;;  %v634_v37 = vadd.f32 %v628_v30, %v623_v32  ;;  %v635_v38 = vadd.f32 %v628_v30, %v624_v33 }
 0x17a   : > { %v632_v45 = vadd.f32 %v628_v30, %v621_v41  ;;  %v633_v46 = vadd.f32 %v628_v30, %v622_v42  ;;  %v636_v47 = vadd.f32 %v628_v30, %v625_v43  ;;  %v637_v48 = vadd.f32 %v628_v30, %v626_v44 }
 0x17b   : > { %v638_v39 = vpack.c.bf16 %v631_v36, %v630_v35  ;;  %v640_v40 = vpack.c.bf16 %v635_v38, %v634_v37  ;;  %v848_v53 = vmul.f32 %v1880_v51, %v2332_v4  ;;  %v849_v54 = vmul.f32 %v1880_v51, %v2335_v5 }
 0x17c   : > { %v639_v49 = vpack.c.bf16 %v633_v46, %v632_v45  ;;  %v641_v50 = vpack.c.bf16 %v637_v48, %v636_v47  ;;  %v850_v58 = vmul.f32 %v1880_v51, %v2341_v7  ;;  %v851_v59 = vmul.f32 %v1880_v51, %v2344_v8 }
 0x17d   : > { %752 = vmatmul.bf16.vlgmr.msra.gmra.mxu2 %v638_v39  ;;  %781 = vmatmul.bf16.vlgmr.msra.gmra.mxu1 %v638_v39  ;;  %v852_v63 = vmul.f32 %v1880_v51, %v2356_v13  ;;  %v853_v0 = vmul.f32 %v1880_v51, %v2367_v19  ;;  %v854_v6 = vmul.f32 %v1880_v51, %v2376_v24  ;;  %v661_v13 = vperm.slane %v658_v12, 1 }
 0x17e   : > { %791 = vmatmul.bf16.vlgmr.msra.gmra.mxu3 %v640_v40  ;;  %v1881_v52 = vld [vmem:[#allocation3] ss:$0 sm:$0xff]  ;;  %v855_v9 = vmul.f32 %v1880_v51, %v2385_v29 }
 0x17f   : > { %v860_v55 = vadd.f32 %v1881_v52, %v848_v53  ;;  %v861_v56 = vadd.f32 %v1881_v52, %v849_v54  ;;  %v862_v60 = vadd.f32 %v1881_v52, %v850_v58  ;;  %v863_v61 = vadd.f32 %v1881_v52, %v851_v59 }
 0x180   : > { %v864_v1 = vadd.f32 %v1881_v52, %v852_v63  ;;  %v865_v2 = vadd.f32 %v1881_v52, %v853_v0  ;;  %v866_v7 = vadd.f32 %v1881_v52, %v854_v6  ;;  %v867_v10 = vadd.f32 %v1881_v52, %v855_v9 }
 0x181   : > { %v868_v57 = vpack.c.bf16 %v861_v56, %v860_v55  ;;  %v869_v62 = vpack.c.bf16 %v863_v61, %v862_v60 }
 0x182   : > { %v870_v3 = vpack.c.bf16 %v865_v2, %v864_v1  ;;  %v871_v8 = vpack.c.bf16 %v867_v10, %v866_v7  ;;  %v1882_v1 = vld [vmem:[%s2539_s6] ss:$0 sm:$0xff] }
 0x18d   : > { %757 = vmatmul.bf16.gmra.mxu2 %v639_v49  ;;  %786 = vmatmul.bf16.gmra.mxu1 %v639_v49 }
 0x18e   : > { %796 = vmatmul.bf16.gmra.mxu3 %v641_v50 }
 0x19d   : > { %762 = vmatmul.bf16.gmra.mxu2 %v640_v40  ;;  %948 = vmatmul.bf16.vlgmr.msrb.gmra.mxu1 %v868_v57 }
 0x1ad   : > { %767 = vmatmul.bf16.gmra.mxu2 %v641_v50  ;;  %953 = vmatmul.bf16.gmra.mxu1 %v869_v62 }
 0x1bd   : > { %958 = vmatmul.bf16.gmra.mxu1 %v870_v3 }
 0x1cd   : > { %963 = vmatmul.bf16.gmra.mxu1 %v871_v8 }
 0x1fa   : > { %v782_v11 = vpop.f32.mrf.mxu1 }
 0x1fb   : > { %v783_v16 = vadd.f32 %v782_v11, %v661_v13 }
 0x200   : > { %v753_v14 = vpop.f32.mrf.mxu2 }
 0x201   : > { %v792_v19 = vpop.f32.mrf.mxu3  ;;  %v754_v29 = vadd.f32 %v753_v14, %v660_v18 }
 0x202   : > { %v784_v15 = vpop.f32.mrf.mxu1  ;;  %v793_v23 = vadd.f32 %v792_v19, %v661_v13 }
 0x203   : > { %v785_v17 = vadd.f32 %v784_v15, %v661_v13 }
 0x205   : > { %v1738_v20 = vpack.c.bf16 %v785_v17, %v783_v16 }
 0x207   : > { %1739 = vst [vmem:[#allocation5] sm:$0xff] %v1738_v20  }
 0x208   : > { %v755_v24 = vpop.f32.mrf.mxu2 }
 0x209   : > { %v756_v21 = vadd.f32 %v755_v24, %v660_v18  ;;  %v794_v22 = vpop.f32.mrf.mxu3 }
 0x20a   : > { %v795_v25 = vadd.f32 %v794_v22, %v661_v13  ;;  %v787_v26 = vpop.f32.mrf.mxu1 }
 0x20b   : > { %v1718_v27 = vpack.c.bf16 %v756_v21, %v754_v29  ;;  %v788_v33 = vadd.f32 %v787_v26, %v661_v13 }
 0x20c   : > { %v1748_v28 = vpack.c.bf16 %v795_v25, %v793_v23 }
 0x20d   : > { %1719 = vst [vmem:[#allocation4 + $0x10] sm:$0xff] %v1718_v27  }
 0x20e   : > { %1759 = vst [vmem:[#allocation5 + $0x8] sm:$0xff] %v1748_v28   ;;  %v1702_v53 = vld [vmem:[#allocation5] sm:$0xff] }
 0x210   : > { %v758_v30 = vpop.f32.mrf.mxu2 }
 0x211   : > { %v797_v31 = vpop.f32.mrf.mxu3  ;;  %v759_v37 = vadd.f32 %v758_v30, %v660_v18 }
 0x212   : > { %v789_v32 = vpop.f32.mrf.mxu1  ;;  %v798_v40 = vadd.f32 %v797_v31, %v661_v13 }
 0x213   : > { %v790_v34 = vadd.f32 %v789_v32, %v661_v13 }
 0x214   : > { %v1698_v0 = vld [vmem:[#allocation4 + $0x10] sm:$0xff] }
 0x215   : > { %v1743_v35 = vpack.c.bf16 %v790_v34, %v788_v33  ;;  %v1704_v49 = vld [vmem:[#allocation5 + $0x8] sm:$0xff] }
 0x217   : > { %1758 = vst [vmem:[#allocation5 + $0x18] sm:$0xff] %v1743_v35  }
 0x218   : > { %v760_v36 = vpop.f32.mrf.mxu2 }
 0x219   : > { %v761_v38 = vadd.f32 %v760_v36, %v660_v18  ;;  %v799_v39 = vpop.f32.mrf.mxu3 }
 0x21a   : > { %v800_v41 = vadd.f32 %v799_v39, %v661_v13  ;;  %v949_v59 = vpop.f32.mrf.mxu1 }
 0x21b   : > { %v1723_v42 = vpack.c.bf16 %v761_v38, %v759_v37  ;;  %v950_v3 = vadd.f32 %v1882_v1, %v949_v59 }
 0x21c   : > { %v1753_v43 = vpack.c.bf16 %v800_v41, %v798_v40 }
 0x21d   : > { %1755 = vst [vmem:[#allocation4] sm:$0xff] %v1723_v42  }
 0x21e   : > { %1760 = vst [vmem:[#allocation5 + $0x10] sm:$0xff] %v1753_v43   ;;  %v1703_v51 = vld [vmem:[#allocation5 + $0x18] sm:$0xff] }
 0x220   : > { %v763_v44 = vpop.f32.mrf.mxu2 }
 0x221   : > { %v764_v47 = vadd.f32 %v763_v44, %v660_v18 }
 0x222   : > { %v951_v61 = vpop.f32.mrf.mxu1 }
 0x223   : > { %v952_v2 = vadd.f32 %v1882_v1, %v951_v61 }
 0x224   : > { %v1699_v62 = vld [vmem:[#allocation4] sm:$0xff] }
 0x225   : > { %v1705_v45 = vld [vmem:[#allocation5 + $0x10] sm:$0xff]  ;;  %v969_v6 = vpack.c.bf16 %v952_v2, %v950_v3  ;;  %v1713_v2 = vld [vmem:[#allocation12 + $0x38] sm:$0xff] }
 0x226   : > { %1147 = vmatpush.bf16.msra.mxu1 %v1705_v45  ;;  %1769 = vmatpush.bf16.msrb.mxu2 %v1705_v45 }
 0x227   : > { %1248 = vmatpush.bf16.msrb.mxu3 %v1713_v2  ;;  %v1918_v2 = vld [vmem:[%s2326_s13 + $0x10] sm:$0xff] }
 0x228   : > { %v765_v46 = vpop.f32.mrf.mxu2 }
 0x229   : > { %v766_v48 = vadd.f32 %v765_v46, %v660_v18 }
 0x22a   : > { %1148 = vmatpush.bf16.msra.mxu1 %v1704_v49  ;;  %1770 = vmatpush.bf16.msrb.mxu2 %v1704_v49  ;;  %v954_v63 = vpop.f32.mrf.mxu1 }
 0x22b   : > { %v1728_v50 = vpack.c.bf16 %v766_v48, %v764_v47  ;;  %v955_v8 = vadd.f32 %v1882_v1, %v954_v63 }
 0x22d   : > { %1756 = vst [vmem:[#allocation4 + $0x18] sm:$0xff] %v1728_v50  }
 0x22e   : > { %1149 = vmatpush.bf16.msra.mxu1 %v1703_v51  ;;  %1771 = vmatpush.bf16.msrb.mxu2 %v1703_v51 }
 0x230   : > { %v768_v52 = vpop.f32.mrf.mxu2 }
 0x231   : > { %v769_v55 = vadd.f32 %v768_v52, %v660_v18 }
 0x232   : > { %1150 = vmatpush.bf16.msra.mxu1 %v1702_v53  ;;  %1772 = vmatpush.bf16.msrb.mxu2 %v1702_v53  ;;  %v956_v9 = vpop.f32.mrf.mxu1 }
 0x233   : > { %v957_v10 = vadd.f32 %v1882_v1, %v956_v9  ;;  %v1712_v9 = vld [vmem:[#allocation12 + $0x30] sm:$0xff] }
 0x234   : > { %v1700_v60 = vld [vmem:[#allocation4 + $0x18] sm:$0xff]  ;;  %1249 = vmatpush.bf16.msrb.mxu3 %v1712_v9 }
 0x235   : > { %v970_v11 = vpack.c.bf16 %v957_v10, %v955_v8  ;;  %v1711_v8 = vld [vmem:[#allocation12 + $0x28] sm:$0xff] }
 0x238   : > { %v770_v54 = vpop.f32.mrf.mxu2  ;;  %1250 = vmatpush.bf16.msrb.mxu3 %v1711_v8  ;;  %v1919_v8 = vld [vmem:[%s2326_s13 + $0x18] sm:$0xff] }
 0x239   : > { %v771_v56 = vadd.f32 %v770_v54, %v660_v18 }
 0x23a   : > { %v959_v7 = vpop.f32.mrf.mxu1 }
 0x23b   : > { %v1733_v57 = vpack.c.bf16 %v771_v56, %v769_v55  ;;  %v960_v14 = vadd.f32 %v1882_v1, %v959_v7 }
 0x23d   : > { %1757 = vst [vmem:[#allocation4 + $0x8] sm:$0xff] %v1733_v57  }
 0x242   : > { %v961_v12 = vpop.f32.mrf.mxu1 }
 0x243   : > { %v962_v13 = vadd.f32 %v1882_v1, %v961_v12 }
 0x244   : > { %v1701_v58 = vld [vmem:[#allocation4 + $0x8] sm:$0xff] }
 0x245   : > { %1009 = vmatpush.bf16.xpose.msra.mxu0 %v1701_v58  ;;  %v971_v15 = vpack.c.bf16 %v962_v13, %v960_v14 }
 0x24a   : > { %v964_v19 = vpop.f32.mrf.mxu1 }
 0x24b   : > { %v965_v18 = vadd.f32 %v1882_v1, %v964_v19 }
 0x24d   : > { %1010 = vmatpush.bf16.xpose.msra.mxu0 %v1700_v60 }
 0x252   : > { %v966_v16 = vpop.f32.mrf.mxu1 }
 0x253   : > { %v967_v17 = vadd.f32 %v1882_v1, %v966_v16 }
 0x255   : > { %1011 = vmatpush.bf16.xpose.msra.mxu0 %v1699_v62  ;;  %v972_v20 = vpack.c.bf16 %v967_v17, %v965_v18  ;;  %v1709_v18 = vld [vmem:[#allocation12 + $0x18] sm:$0xff] }
 0x25d   : > { %1012 = vmatpush.bf16.xpose.msra.mxu0 %v1698_v0 }
 0x264   : > { %1013 = vmatmul.bf16.vlgmr.msra.gmra.mxu0 %v969_v6 }
 0x274   : > { %1018 = vmatmul.bf16.gmra.mxu0 %v970_v11  ;;  %v1710_v11 = vld [vmem:[#allocation12 + $0x20] sm:$0xff] }
 0x275   : > { %1251 = vmatpush.bf16.msrb.mxu3 %v1710_v11 }
 0x279   : > { %1252 = vmatpush.bf16.msrb.mxu3 %v1709_v18 }
 0x284   : > { %1023 = vmatmul.bf16.gmra.mxu0 %v971_v15 }
 0x294   : > { %1028 = vmatmul.bf16.gmra.mxu0 %v972_v20 }
 0x2e1   : > { %v1014_v24 = vpop.f32.mrf.mxu0 }
 0x2e2   : > { %v1035_v29 = vsel %vm1034_vm5, %v1014_v24, -inf }
 0x2e3   : > { %1036 = vmax.xlane.f32.xlu0 %v1035_v29 }
 0x2e9   : > { %v1016_v21 = vpop.f32.mrf.mxu0 }
 0x2ea   : > { %v1038_v22 = vsel %vm1034_vm5, %v1016_v21, -inf }
 0x2eb   : > { %1039 = vmax.xlane.f32.xlu0 %v1038_v22 }
 0x2f1   : > { %v1019_v23 = vpop.f32.mrf.mxu0 }
 0x2f2   : > { %v1041_v25 = vsel %vm1034_vm5, %v1019_v23, -inf }
 0x2f3   : > { %1042 = vmax.xlane.f32.xlu1 %v1041_v25 }
 0x2f9   : > { %v1021_v26 = vpop.f32.mrf.mxu0 }
 0x2fa   : > { %v1044_v27 = vsel %vm1034_vm5, %v1021_v26, -inf }
 0x2fb   : > { %1045 = vmax.xlane.f32.xlu1 %v1044_v27  ;;  %v1708_v27 = vld [vmem:[#allocation12 + $0x10] sm:$0xff] }
 0x2fc   : > { %1253 = vmatpush.bf16.msrb.mxu3 %v1708_v27 }
 0x301   : > { %v1024_v28 = vpop.f32.mrf.mxu0 }
 0x302   : > { %v1047_v30 = vsel %vm1034_vm5, %v1024_v28, -inf }
 0x303   : > { %1048 = vmax.xlane.f32.xlu2 %v1047_v30  ;;  %v1707_v30 = vld [vmem:[#allocation12 + $0x8] sm:$0xff] }
 0x304   : > { %1254 = vmatpush.bf16.msrb.mxu3 %v1707_v30 }
 0x309   : > { %v1026_v31 = vpop.f32.mrf.mxu0 }
 0x30a   : > { %v1050_v32 = vsel %vm1034_vm5, %v1026_v31, -inf }
 0x30b   : > { %1051 = vmax.xlane.f32.xlu2 %v1050_v32 }
 0x311   : > { %v2460_v33 = vpop.f32.mrf.mxu0 }
 0x312   : > { %v1053_v34 = vsel %vm1034_vm5, %v2460_v33, -inf }
 0x313   : > { %1054 = vmax.xlane.f32.xlu0 %v1053_v34 }
 0x319   : > { %v1031_v35 = vpop.f32.mrf.mxu0 }
 0x31a   : > { %v1056_v36 = vsel %vm1034_vm5, %v1031_v35, -inf }
 0x31b   : > { %1057 = vmax.xlane.f32.xlu1 %v1056_v36 }
 0x356   : > { %v1037_v37 = vpop.xlane.xlu0 %1036 }
 0x357   : > { %v1059_v39 = vsub.f32 %v1014_v24, %v1037_v37 }
 0x35e   : > { %v1040_v38 = vpop.xlane.xlu0 %1039 }
 0x35f   : > { %v1060_v40 = vsub.f32 %v1016_v21, %v1040_v38 }
 0x361   : > { %v1067_v41 = vpack.c.bf16 %v1060_v40, %v1059_v39 }
 0x363   : > { %v1071_v42 = vunpack.c.l.bf16 %v1067_v41  ;;  %v1072_v43 = vunpack.c.h.bf16 %v1067_v41 }
 0x365   : > { %v1079_v44 = vmul.f32 1.442695, %v1071_v42  ;;  %v1081_v45 = vmul.f32 1.442695, %v1072_v43 }
 0x366   : > { %v1043_v46 = vpop.xlane.xlu1 %1042 }
 0x367   : > { %1886 = vpow2.f32 %v1079_v44  ;;  %v1061_v50 = vsub.f32 %v1019_v23, %v1043_v46 }
 0x368   : > { %1888 = vpow2.f32 %v1081_v45 }
 0x36d   : > { %v1887_v47 = vpop.eup %1886 }
 0x36e   : > { %v1889_v48 = vpop.eup %1888  ;;  %v1046_v49 = vpop.xlane.xlu1 %1045 }
 0x36f   : > { %v1062_v51 = vsub.f32 %v1021_v26, %v1046_v49  ;;  %v1095_v52 = vpack.c.bf16 %v1889_v48, %v1887_v47 }
 0x371   : > { %v1068_v53 = vpack.c.bf16 %v1062_v51, %v1061_v50  ;;  %1632 = vmatmul.msk.bf16.vlgmr.msra.gmra.mxu1 %vm1034_vm5, %v1095_v52  ;;  %v1883_v52 = vld [vmem:[%s2543_s10] ss:$0 sm:$0xff] }
 0x373   : > { %v1073_v54 = vunpack.c.l.bf16 %v1068_v53  ;;  %v1074_v55 = vunpack.c.h.bf16 %v1068_v53 }
 0x375   : > { %v1083_v56 = vmul.f32 1.442695, %v1073_v54  ;;  %v1085_v57 = vmul.f32 1.442695, %v1074_v55 }
 0x376   : > { %v1049_v58 = vpop.xlane.xlu2 %1048 }
 0x377   : > { %1890 = vpow2.f32 %v1083_v56  ;;  %v1063_v62 = vsub.f32 %v1024_v28, %v1049_v58  ;;  %v2144_v28 = vmov 64  }
 0x378   : > { %1892 = vpow2.f32 %v1085_v57  ;;  %1876 = vset.pattern.permute.xlu2 %v2144_v28  ;;  %1877 = vset.pattern.permute.xlu0 %v2144_v28 }
 0x379   : > { %1878 = vset.pattern.permute.xlu1 %v2144_v28 }
 0x37d   : > { %v1891_v59 = vpop.eup %1890 }
 0x37e   : > { %v1893_v60 = vpop.eup %1892  ;;  %v1052_v61 = vpop.xlane.xlu2 %1051 }
 0x37f   : > { %v1064_v63 = vsub.f32 %v1026_v31, %v1052_v61  ;;  %v1096_v0 = vpack.c.bf16 %v1893_v60, %v1891_v59  ;;  %v1706_v31 = vld [vmem:[#allocation12] sm:$0xff] }
 0x380   : > { %1255 = vmatpush.bf16.msrb.mxu3 %v1706_v31 }
 0x381   : > { %v1069_v1 = vpack.c.bf16 %v1064_v63, %v1063_v62  ;;  %1633 = vmatmul.msk.bf16.vlgmr.msrb.gmra.mxu2 %vm1034_vm5, %v1096_v0 }
 0x383   : > { %v1075_v3 = vunpack.c.l.bf16 %v1069_v1  ;;  %v1076_v6 = vunpack.c.h.bf16 %v1069_v1 }
 0x385   : > { %v1087_v7 = vmul.f32 1.442695, %v1075_v3  ;;  %v1089_v10 = vmul.f32 1.442695, %v1076_v6 }
 0x386   : > { %v1055_v12 = vpop.xlane.xlu0 %1054 }
 0x387   : > { %1894 = vpow2.f32 %v1087_v7  ;;  %v1065_v15 = vsub.f32 %v2460_v33, %v1055_v12 }
 0x388   : > { %1896 = vpow2.f32 %v1089_v10 }
 0x38d   : > { %v1895_v13 = vpop.eup %1894 }
 0x38e   : > { %v1897_v14 = vpop.eup %1896  ;;  %v1058_v19 = vpop.xlane.xlu1 %1057 }
 0x38f   : > { %v1066_v16 = vsub.f32 %v1031_v35, %v1058_v19  ;;  %v1097_v17 = vpack.c.bf16 %v1897_v14, %v1895_v13  ;;  %v1920_v19 = vld [vmem:[%s2326_s13 + $0x20] sm:$0xff] }
 0x391   : > { %v1070_v20 = vpack.c.bf16 %v1066_v16, %v1065_v15  ;;  %1634 = vmatmul.msk.bf16.gmra.mxu2 %vm1034_vm5, %v1097_v17 }
 0x393   : > { %v1077_v24 = vunpack.c.l.bf16 %v1070_v20  ;;  %v1078_v29 = vunpack.c.h.bf16 %v1070_v20 }
 0x395   : > { %v1091_v21 = vmul.f32 1.442695, %v1077_v24  ;;  %v1093_v22 = vmul.f32 1.442695, %v1078_v29  ;;  %v1921_v24 = vld [vmem:[%s2326_s13 + $0x28] sm:$0xff] }
 0x397   : > { %1898 = vpow2.f32 %v1091_v21 }
 0x398   : > { %1900 = vpow2.f32 %v1093_v22 }
 0x39d   : > { %v1899_v23 = vpop.eup %1898 }
 0x39e   : > { %v1901_v25 = vpop.eup %1900 }
 0x39f   : > { %v1098_v26 = vpack.c.bf16 %v1901_v25, %v1899_v23 }
 0x3a1   : > { %1635 = vmatmul.msk.bf16.gmra.mxu2 %vm1034_vm5, %v1098_v26  ;;  %v1922_v26 = vld [vmem:[%s2326_s13 + $0x30] sm:$0xff] }
 0x3ee   : > { %v1152_v32 = vpop.f32.mrf.mxu1 }
 0x3ef   : > { %1902 = vrcp.f32 %v1152_v32 }
 0x3f5   : > { %v1903_v33 = vpop.eup %1902 }
 0x3f6   : > { %v1154_v34 = vpop.f32.mrf.mxu1  ;;  %1279 = vperm.xlu2 %1876, %v1903_v33   ;;  %v1923_v33 = vld [vmem:[%s2326_s13 + $0x38] sm:$0xff] }
 0x3f7   : > { %1904 = vrcp.f32 %v1154_v34  ;;  %v1180_v35 = vpack.c.bf16 %v1154_v34, %v1152_v32 }
 0x3f9   : > { %1256 = vmatmul.bf16.vlgmr.msrb.gmra.mxu3 %v1180_v35 }
 0x3fd   : > { %v1905_v36 = vpop.eup %1904 }
 0x3fe   : > { %1284 = vperm.xlu0 %1877, %v1905_v36  }
 0x404   : > { %v1157_v37 = vpop.f32.mrf.mxu2 }
 0x405   : > { %1906 = vrcp.f32 %v1157_v37 }
 0x40b   : > { %v1907_v38 = vpop.eup %1906 }
 0x40c   : > { %v1159_v39 = vpop.f32.mrf.mxu2  ;;  %1289 = vperm.xlu1 %1878, %v1907_v38  }
 0x40d   : > { %1908 = vrcp.f32 %v1159_v39  ;;  %v1181_v40 = vpack.c.bf16 %v1159_v39, %v1157_v37 }
 0x40f   : > { %1261 = vmatmul.bf16.gmra.mxu3 %v1181_v40 }
 0x413   : > { %v1909_v41 = vpop.eup %1908 }
 0x414   : > { %1294 = vperm.xlu2 %1876, %v1909_v41   ;;  %v1162_v42 = vpop.f32.mrf.mxu2 }
 0x415   : > { %1910 = vrcp.f32 %v1162_v42 }
 0x41b   : > { %v1911_v43 = vpop.eup %1910 }
 0x41c   : > { %1299 = vperm.xlu2 %1876, %v1911_v43   ;;  %v1164_v44 = vpop.f32.mrf.mxu2 }
 0x41d   : > { %1912 = vrcp.f32 %v1164_v44  ;;  %v1182_v45 = vpack.c.bf16 %v1164_v44, %v1162_v42 }
 0x41f   : > { %1266 = vmatmul.bf16.gmra.mxu3 %v1182_v45 }
 0x423   : > { %v1913_v46 = vpop.eup %1912 }
 0x424   : > { %1304 = vperm.xlu1 %1878, %v1913_v46   ;;  %v1167_v47 = vpop.f32.mrf.mxu2 }
 0x425   : > { %1914 = vrcp.f32 %v1167_v47 }
 0x42b   : > { %v1915_v48 = vpop.eup %1914 }
 0x42c   : > { %1309 = vperm.xlu2 %1876, %v1915_v48   ;;  %v1169_v49 = vpop.f32.mrf.mxu2 }
 0x42d   : > { %1916 = vrcp.f32 %v1169_v49  ;;  %v1183_v50 = vpack.c.bf16 %v1169_v49, %v1167_v47 }
 0x42f   : > { %1271 = vmatmul.bf16.gmra.mxu3 %v1183_v50 }
 0x433   : > { %v1917_v51 = vpop.eup %1916 }
 0x434   : > { %1314 = vperm.xlu1 %1878, %v1917_v51  }
 0x450   : > { %v1280_v53 = vpop.permute.xlu2 %1279 }
 0x46e   : > { %v1295_v6 = vpop.permute.xlu2 %1294 }
 0x470   : > { %v1285_v58 = vpop.permute.xlu0 %1284 }
 0x47c   : > { %v1257_v54 = vpop.f32.mrf.mxu3 }
 0x47d   : > { %v1317_v55 = vmul.f32 %v1280_v53, %v1257_v54 }
 0x47e   : > { %v1290_v63 = vpop.permute.xlu1 %1289 }
 0x47f   : > { %v1329_v56 = vadd.f32 %v1883_v52, %v1317_v55 }
 0x481   : > { %v1337_v57 = vadd.f32 %v1329_v56, %v2332_v4 }
 0x483   : > { %1345 = vst [vmem:[%s2477_s1] sm:$0xff] %v1337_v57 }
 0x484   : > { %v1259_v59 = vpop.f32.mrf.mxu3 }
 0x485   : > { %v1318_v60 = vmul.f32 %v1285_v58, %v1259_v59 }
 0x487   : > { %v1330_v61 = vadd.f32 %v1883_v52, %v1318_v60 }
 0x489   : > { %v1338_v62 = vadd.f32 %v1330_v61, %v2335_v5  ;;  %v1300_v5 = vpop.permute.xlu2 %1299 }
 0x48b   : > { %1346 = vst [vmem:[%s2477_s1 + $0x8] sm:$0xff] %v1338_v62 }
 0x491   : > { %v1310_v21 = vpop.permute.xlu2 %1309 }
 0x492   : > { %v1262_v0 = vpop.f32.mrf.mxu3 }
 0x493   : > { %v1319_v1 = vmul.f32 %v1290_v63, %v1262_v0 }
 0x495   : > { %v1331_v4 = vadd.f32 %v1883_v52, %v1319_v1 }
 0x496   : > { %v1305_v16 = vpop.permute.xlu1 %1304 }
 0x497   : > { %v1339_v3 = vadd.f32 %v1918_v2, %v1331_v4 }
 0x499   : > { %1347 = vst [vmem:[%s2477_s1 + $0x10] sm:$0xff] %v1339_v3 }
 0x49a   : > { %v1264_v9 = vpop.f32.mrf.mxu3 }
 0x49b   : > { %v1320_v7 = vmul.f32 %v1295_v6, %v1264_v9 }
 0x49d   : > { %v1332_v10 = vadd.f32 %v1883_v52, %v1320_v7 }
 0x49f   : > { %v1340_v11 = vadd.f32 %v1919_v8, %v1332_v10 }
 0x4a1   : > { %1348 = vst [vmem:[%s2477_s1 + $0x18] sm:$0xff] %v1340_v11 }
 0x4a2   : > { %v1267_v12 = vpop.f32.mrf.mxu3 }
 0x4a3   : > { %v1321_v13 = vmul.f32 %v1300_v5, %v1267_v12 }
 0x4a5   : > { %v1333_v14 = vadd.f32 %v1883_v52, %v1321_v13 }
 0x4a6   : > { %v1315_v28 = vpop.permute.xlu1 %1314 }
 0x4a7   : > { %v1341_v15 = vadd.f32 %v1920_v19, %v1333_v14 }
 0x4a9   : > { %1349 = vst [vmem:[%s2477_s1 + $0x20] sm:$0xff] %v1341_v15 }
 0x4aa   : > { %v1269_v17 = vpop.f32.mrf.mxu3 }
 0x4ab   : > { %v1322_v18 = vmul.f32 %v1305_v16, %v1269_v17 }
 0x4ad   : > { %v1334_v20 = vadd.f32 %v1883_v52, %v1322_v18 }
 0x4af   : > { %v1342_v29 = vadd.f32 %v1921_v24, %v1334_v20 }
 0x4b1   : > { %1350 = vst [vmem:[%s2477_s1 + $0x28] sm:$0xff] %v1342_v29 }
 0x4b2   : > { %v1272_v22 = vpop.f32.mrf.mxu3 }
 0x4b3   : > { %v1323_v23 = vmul.f32 %v1310_v21, %v1272_v22 }
 0x4b5   : > { %v1335_v25 = vadd.f32 %v1883_v52, %v1323_v23 }
 0x4b7   : > { %v1343_v27 = vadd.f32 %v1922_v26, %v1335_v25 }
 0x4b9   : > { %1351 = vst [vmem:[%s2477_s1 + $0x30] sm:$0xff] %v1343_v27 }
 0x4ba   : > { %v1274_v30 = vpop.f32.mrf.mxu3 }
 0x4bb   : > { %v1324_v31 = vmul.f32 %v1315_v28, %v1274_v30 }
 0x4bd   : > { %v1336_v32 = vadd.f32 %v1883_v52, %v1324_v31 }
 0x4bf   : > { %v1344_v34 = vadd.f32 %v1923_v33, %v1336_v32 }
 0x4c1   : > { %1352 = vst [vmem:[%s2477_s1 + $0x38] sm:$0xff] %v1344_v34 }
 0x4c2   : > { %2071 = shalt.err (!%p2068_p9)
}
 0x4c3   : > { %s2145_s13 = smov 128   ;;  %s2146_s26 = smov 8  }
 0x4c4   : > { %1789 = dma.vmem_to_hbm [thread:$0]  (%p2247_p4), %s1369_s27, 1024, %s1371_s29, %s1354_s20, %s2145_s13, %s2145_s13, %s2146_s26  }
 0x4c5 PF: > { %s2572_s15 = sld [smem:[#allocation22_spill]] }
 0x4c6   : > { %s2573_s21 = sld [smem:[#allocation19_spill]] }
 0x4cb   : > { %p1816_p10 = scmp.ge.s32.totalorder %s2572_s15, 2 }
 0x4cc   : > { %s1385_s5 = sand.u32 1, %s2573_s21  }
 0x4cd   : > { %p1805_p11 = pnand %p1816_p10, %p2254_p8  ;;  %s1386_s17 = scalar_lea.sflag [#allocation8], %s1385_s5 }
 0x4cf   : > { %p1806_p12 = pneg %p1805_p11 }
 0x4d1   : > { %2109 = dma.done.wait (%p1806_p12), %s1386_s17, 1024  }
 0x4d2   : > { %2111 = vsyncadd (%p1806_p12), %s1386_s17, 4294966272  ;;  %s27_s22 = sadd.s32 1, %s2572_s15   ;;  %s2575_s19 = sld [smem:[#allocation20_spill]] }
 0x4d3   : > { %p24_p13 = scmp.ge.s32.totalorder %s27_s22, 4   ;;  %s2576_s30 = sld [smem:[#allocation26_spill]] }
 0x4d4   : > { %s2577_s20 = sld [smem:[#allocation21_spill]]  ;;  %s2579_s17 = smov %s2118_s18 }
 0x4d5   : > { %s2578_s21 = sld [smem:[#allocation23_spill]]  ;;  %26 = sbr.rel (!%p24_p13) target bundleno = 10 (0xa), region = 121 }
 0x4d8   : > { %s2580_s18 = smov %s2575_s19 }
 0x4d9   : > { %s2581_s19 = smov %s2576_s30 }
 0x4da   :  { %1392 = vsyncpa [#allocation7], 1 }
 0x4db   :  { %1394 = vsyncpa [#allocation7 + $0x1], 1 }
 0x4dc   :  { %1395 = vsyncpa [#allocation10], 1 }
 0x4dd   :  { %1396 = vsyncpa [#allocation13], 1 }
 0x4de   :  { %1397 = vsyncpa [#allocation8], 1 }
 0x4df   :  { %1399 = vsyncpa [#allocation8 + $0x1], 1 }

</bundles_post_ra>
